<compile_context>
chip_gen: v7x
topology: tpu7x:2x2x1
jax: 0.10.0
libtpu: 0.0.40
codegen_flags: <defaults>
</compile_context>

<pallas_src>
import jax
import jax.numpy as jnp
from jax.experimental import pallas as pl
from jax.experimental.pallas import tpu as pltpu


def rnn_v2_kernel(ids_ref, emb_tab_ref, h0_ref, c0_ref,
                  w_ih_ref, w_hh_ref, b_ref,
                  gamma_ref, beta_ref, fcw_t_ref, fcb_ref,
                  out_ref, h_ref, c_ref):
    # ids:     [B, 1]  int32 token ids
    # emb_tab: [V, E]  bf16 embedding table
    # h0, c0:  [2, B, H] f32 recurrent state (PyTorch layout)
    # w_ih:    [E, 8H] bf16, columns = [i,f,g,o]_fwd | [i,f,g,o]_bwd (H each)
    # w_hh:    [2, H, 4H] bf16, per-direction recurrent weights (no zero padding)
    # b:       [1, 8H] f32 pre-summed bih+bhh, same column order as w_ih
    # gamma/beta: [1, 2H];  fcw_t: [2H, V] bf16;  fcb: [1, V]
    B = ids_ref.shape[0]
    V = emb_tab_ref.shape[0]
    H = h0_ref.shape[-1]
    H4 = 4 * H
    cdt = emb_tab_ref.dtype                                   # bf16 compute dtype

    # Fused embedding gather: one-hot(ids) @ table on the MXU (exact row pick).
    onehot = (ids_ref[...] ==
              jax.lax.broadcasted_iota(jnp.int32, (B, V), 1)).astype(cdt)
    emb = jnp.dot(onehot, emb_tab_ref[...],
                  preferred_element_type=jnp.float32).astype(cdt)        # [B, E]

    # Single fused input->gate projection for BOTH directions (+ pre-summed bias).
    gates = (jnp.dot(emb, w_ih_ref[...], preferred_element_type=jnp.float32)
             + b_ref[...])                                               # [B, 8H]

    h_dirs = []
    for d in range(2):                                        # static dir unroll
        # Dense recurrent contribution for this direction (no zero blocks).
        g_d = gates[:, d * H4:(d + 1) * H4] + jnp.dot(
            h0_ref[d].astype(cdt), w_hh_ref[d],
            preferred_element_type=jnp.float32)                          # [B, 4H]

        # 128-lane-aligned gate slices (PyTorch order i, f, g, o).
        i_g = jax.nn.sigmoid(g_d[:, 0 * H:1 * H])
        f_g = jax.nn.sigmoid(g_d[:, 1 * H:2 * H])
        g_g = jnp.tanh(g_d[:, 2 * H:3 * H])
        o_g = jax.nn.sigmoid(g_d[:, 3 * H:4 * H])

        c_new = f_g * c0_ref[d] + i_g * g_g                              # [B, H]
        h_new = o_g * jnp.tanh(c_new)                                    # [B, H]

        # Write state straight into the [2, B, H] (aliased, in-place) outputs.
        h_ref[d] = h_new
        c_ref[d] = c_new
        h_dirs.append(h_new)

    # LayerNorm over the 2H feature axis (PyTorch default eps = 1e-5).
    feats = jnp.concatenate(h_dirs, axis=-1)                             # [B, 2H]
    mean = jnp.mean(feats, axis=-1, keepdims=True)
    var = jnp.mean((feats - mean) ** 2, axis=-1, keepdims=True)
    normed = (feats - mean) * jax.lax.rsqrt(var + 1e-5)
    normed = normed * gamma_ref[...] + beta_ref[...]

    # Final projection to vocab (bf16 inputs, f32 accumulation).
    out_ref[...] = (jnp.dot(normed.astype(cdt), fcw_t_ref[...],
                            preferred_element_type=jnp.float32)
                    + fcb_ref[...])


def prepare_params(params, compute_dtype=jnp.bfloat16):
    """One-time weight preparation hoisted OUT of the per-step forward.

    Direction-major gate columns ([i,f,g,o]_fwd | [i,f,g,o]_bwd), pre-summed
    biases, pre-transposed FC weight, bf16 matmul weights.
    """
    wih = params["wih"]                       # [2, 4H, E]
    whh = params["whh"]                       # [2, 4H, H]

    w_ih = jnp.concatenate([wih[0].T, wih[1].T], axis=-1)     # [E, 8H]
    w_hh = jnp.stack([whh[0].T, whh[1].T], axis=0)            # [2, H, 4H]
    b_big = jnp.concatenate([params["bih"][0] + params["bhh"][0],
                             params["bih"][1] + params["bhh"][1]])[None, :]  # [1, 8H]

    return {
        "emb_table": params["embedding"].astype(compute_dtype),   # [V, E]
        "w_ih": w_ih.astype(compute_dtype),
        "w_hh": w_hh.astype(compute_dtype),
        "b_big": b_big,                                            # f32
        "gamma": params["ln_w"][None, :],
        "beta": params["ln_b"][None, :],
        "fcw_t": params["fc_w"].T.astype(compute_dtype),           # [2H, V]
        "fcb": params["fc_b"][None, :],                            # [1, V]
    }


@jax.jit
def rnn_v2_forward(x, hidden, cell, prepped):
    """Mirrors RNN_v2.forward(x, hidden, cell) (seq_len == 1 via unsqueeze)."""
    B = x.shape[0]
    V = prepped["emb_table"].shape[0]
    H = hidden.shape[-1]

    ids = x.reshape(B, 1).astype(jnp.int32)

    vmem = pl.BlockSpec(memory_space=pltpu.MemorySpace.VMEM)
    logits, h_out, c_out = pl.pallas_call(
        rnn_v2_kernel,
        out_shape=(jax.ShapeDtypeStruct((B, V), jnp.float32),
                   jax.ShapeDtypeStruct((2, B, H), jnp.float32),
                   jax.ShapeDtypeStruct((2, B, H), jnp.float32)),
        in_specs=[vmem] * 11,
        out_specs=(vmem, vmem, vmem),
        # In-place recurrent state update: hidden -> h_out, cell -> c_out.
        input_output_aliases={2: 1, 3: 2},
    )(ids, prepped["emb_table"], hidden, cell,
      prepped["w_ih"], prepped["w_hh"], prepped["b_big"],
      prepped["gamma"], prepped["beta"], prepped["fcw_t"], prepped["fcb"])

    return logits, h_out, c_out


def reference_forward(x, hidden, cell, params):
    """Pure-JAX f32 reference of the PyTorch forward (seq_len == 1)."""
    emb = jnp.take(params["embedding"], x, axis=0)     # [B, E]
    H = params["whh"].shape[-1]
    hs, h_out, c_out = [], [], []
    for d in range(2):
        gates = (emb @ params["wih"][d].T + hidden[d] @ params["whh"][d].T
                 + params["bih"][d] + params["bhh"][d])
        i_g = jax.nn.sigmoid(gates[:, 0 * H:1 * H])
        f_g = jax.nn.sigmoid(gates[:, 1 * H:2 * H])
        g_g = jnp.tanh(gates[:, 2 * H:3 * H])
        o_g = jax.nn.sigmoid(gates[:, 3 * H:4 * H])
        c_new = f_g * cell[d] + i_g * g_g
        h_new = o_g * jnp.tanh(c_new)
        hs.append(h_new)
        h_out.append(h_new)
        c_out.append(c_new)
    feats = jnp.concatenate(hs, axis=-1)
    mean = jnp.mean(feats, axis=-1, keepdims=True)
    var = jnp.mean((feats - mean) ** 2, axis=-1, keepdims=True)
    normed = (feats - mean) / jnp.sqrt(var + 1e-5)
    normed = normed * params["ln_w"] + params["ln_b"]
    logits = normed @ params["fc_w"].T + params["fc_b"]
    return logits, jnp.stack(h_out), jnp.stack(c_out)


def init_params(key, vocab_size, embed_dim, hidden):
    ks = jax.random.split(key, 8)
    scale = 0.1
    return {
        "embedding": scale * jax.random.normal(ks[0], (vocab_size, embed_dim), jnp.float32),
        # bidirectional LSTM, num_layers=1: [direction, 4H, E] / [direction, 4H, H]
        "wih": scale * jax.random.normal(ks[1], (2, 4 * hidden, embed_dim), jnp.float32),
        "whh": scale * jax.random.normal(ks[2], (2, 4 * hidden, hidden), jnp.float32),
        "bih": scale * jax.random.normal(ks[3], (2, 4 * hidden), jnp.float32),
        "bhh": scale * jax.random.normal(ks[4], (2, 4 * hidden), jnp.float32),
        "ln_w": jnp.ones((2 * hidden,), jnp.float32),
        "ln_b": jnp.zeros((2 * hidden,), jnp.float32),
        "fc_w": scale * jax.random.normal(ks[5], (vocab_size, 2 * hidden), jnp.float32),
        "fc_b": scale * jax.random.normal(ks[6], (vocab_size,), jnp.float32),
    }


if __name__ == "__main__":
    # H = 128 so every gate / feature slice is exactly 128-lane aligned;
    # V = 256 keeps the fused one-hot gather and FC output lane-dense.
    VOCAB, EMBED, HIDDEN, BATCH = 256, 128, 128, 8

    key = jax.random.PRNGKey(0)
    k_par, k_x, k_h, k_c = jax.random.split(key, 4)

    params = init_params(k_par, VOCAB, EMBED, HIDDEN)
    prepped = prepare_params(params)           # one-time weight prep (hoisted)

    x = jax.random.randint(k_x, (BATCH,), 0, VOCAB, dtype=jnp.int32)
    hidden = 0.1 * jax.random.normal(k_h, (2, BATCH, HIDDEN), jnp.float32)
    cell = 0.1 * jax.random.normal(k_c, (2, BATCH, HIDDEN), jnp.float32)

    out, h_out, c_out = rnn_v2_forward(x, hidden, cell, prepped)
    jax.block_until_ready((out, h_out, c_out))

    ref_out, ref_h, ref_c = reference_forward(x, hidden, cell, params)
    assert out.shape == (BATCH, VOCAB)
    assert h_out.shape == (2, BATCH, HIDDEN) and c_out.shape == (2, BATCH, HIDDEN)
    # bf16 matmul weights/activations -> relaxed parity vs. the f32 reference.
    assert jnp.allclose(out, ref_out, atol=3e-2, rtol=3e-2)
    assert jnp.allclose(h_out, ref_h, atol=1e-2, rtol=1e-2)
    assert jnp.allclose(c_out, ref_c, atol=1e-2, rtol=1e-2)

    print("KERNEL_OK")
</pallas_src>

<mosaic_0001>
module attributes {stable_mosaic.version = 11 : i64} {
  func.func @rnn_v2_kernel(%arg0: memref<8x1xi32, #tpu.memory_space<vmem>>, %arg1: memref<256x128xbf16, #tpu.memory_space<vmem>>, %arg2: memref<2x8x128xf32, #tpu.memory_space<vmem>>, %arg3: memref<2x8x128xf32, #tpu.memory_space<vmem>>, %arg4: memref<128x1024xbf16, #tpu.memory_space<vmem>>, %arg5: memref<2x128x512xbf16, #tpu.memory_space<vmem>>, %arg6: memref<1x1024xf32, #tpu.memory_space<vmem>>, %arg7: memref<1x256xf32, #tpu.memory_space<vmem>>, %arg8: memref<1x256xf32, #tpu.memory_space<vmem>>, %arg9: memref<256x256xbf16, #tpu.memory_space<vmem>>, %arg10: memref<1x256xf32, #tpu.memory_space<vmem>>, %arg11: memref<8x256xf32, #tpu.memory_space<vmem>>, %arg12: memref<2x8x128xf32, #tpu.memory_space<vmem>>, %arg13: memref<2x8x128xf32, #tpu.memory_space<vmem>>) attributes {dimension_semantics = [], scalar_prefetch = 0 : i64, scratch_operands = 0 : i64, tpu.core_type = #tpu.core_type<tc>} {
    %c0 = arith.constant 0 : index
    %c0_0 = arith.constant 0 : index
    %0 = vector.load %arg0[%c0, %c0_0] : memref<8x1xi32, #tpu.memory_space<vmem>>, vector<8x1xi32>
    %1 = tpu.iota {dimensions = array<i32: 1>} : vector<8x256xi32>
    %2 = vector.broadcast %0 : vector<8x1xi32> to vector<8x256xi32>
    %3 = arith.cmpi eq, %2, %1 : vector<8x256xi32>
    %4 = arith.extui %3 : vector<8x256xi1> to vector<8x256xi32>
    %5 = arith.sitofp %4 : vector<8x256xi32> to vector<8x256xf32>
    %6 = arith.truncf %5 : vector<8x256xf32> to vector<8x256xbf16>
    %c0_1 = arith.constant 0 : index
    %c0_2 = arith.constant 0 : index
    %7 = vector.load %arg1[%c0_1, %c0_2] : memref<256x128xbf16, #tpu.memory_space<vmem>>, vector<256x128xbf16>
    %cst = arith.constant dense<0.000000e+00> : vector<8x128xf32>
    %8 = tpu.matmul %6, %7, %cst {dimension_numbers = #tpu.dot_dimension_numbers<[1], [0], [0], [1], [0, 0, 1, 1], [], []>} : vector<8x256xbf16>, vector<256x128xbf16>, vector<8x128xf32> -> vector<8x128xf32>
    %9 = arith.truncf %8 : vector<8x128xf32> to vector<8x128xbf16>
    %c0_3 = arith.constant 0 : index
    %c0_4 = arith.constant 0 : index
    %10 = vector.load %arg4[%c0_3, %c0_4] : memref<128x1024xbf16, #tpu.memory_space<vmem>>, vector<128x1024xbf16>
    %cst_5 = arith.constant dense<0.000000e+00> : vector<8x1024xf32>
    %11 = tpu.matmul %9, %10, %cst_5 {dimension_numbers = #tpu.dot_dimension_numbers<[1], [0], [0], [1], [0, 0, 1, 1], [], []>} : vector<8x128xbf16>, vector<128x1024xbf16>, vector<8x1024xf32> -> vector<8x1024xf32>
    %c0_6 = arith.constant 0 : index
    %c0_7 = arith.constant 0 : index
    %12 = vector.load %arg6[%c0_6, %c0_7] : memref<1x1024xf32, #tpu.memory_space<vmem>>, vector<1x1024xf32>
    %13 = vector.broadcast %12 : vector<1x1024xf32> to vector<8x1024xf32>
    %14 = arith.addf %11, %13 : vector<8x1024xf32>
    %15 = vector.extract_strided_slice %14 {offsets = [0, 0], sizes = [8, 512], strides = [1, 1]} : vector<8x1024xf32> to vector<8x512xf32>
    %c0_8 = arith.constant 0 : index
    %c0_9 = arith.constant 0 : index
    %c0_10 = arith.constant 0 : index
    %16 = vector.load %arg2[%c0_8, %c0_9, %c0_10] : memref<2x8x128xf32, #tpu.memory_space<vmem>>, vector<1x8x128xf32>
    %17 = vector.shape_cast %16 : vector<1x8x128xf32> to vector<8x128xf32>
    %18 = arith.truncf %17 : vector<8x128xf32> to vector<8x128xbf16>
    %c0_11 = arith.constant 0 : index
    %c0_12 = arith.constant 0 : index
    %c0_13 = arith.constant 0 : index
    %19 = vector.load %arg5[%c0_11, %c0_12, %c0_13] : memref<2x128x512xbf16, #tpu.memory_space<vmem>>, vector<1x128x512xbf16>
    %20 = vector.shape_cast %19 : vector<1x128x512xbf16> to vector<128x512xbf16>
    %cst_14 = arith.constant dense<0.000000e+00> : vector<8x512xf32>
    %21 = tpu.matmul %18, %20, %cst_14 {dimension_numbers = #tpu.dot_dimension_numbers<[1], [0], [0], [1], [0, 0, 1, 1], [], []>} : vector<8x128xbf16>, vector<128x512xbf16>, vector<8x512xf32> -> vector<8x512xf32>
    %22 = arith.addf %15, %21 : vector<8x512xf32>
    %23 = vector.extract_strided_slice %22 {offsets = [0, 0], sizes = [8, 128], strides = [1, 1]} : vector<8x512xf32> to vector<8x128xf32>
    %24 = arith.negf %23 : vector<8x128xf32>
    %25 = math.exp %24 : vector<8x128xf32>
    %cst_15 = arith.constant 1.000000e+00 : f32
    %26 = vector.broadcast %cst_15 : f32 to vector<8x128xf32>
    %27 = arith.addf %26, %25 : vector<8x128xf32>
    %28 = arith.divf %26, %27 : vector<8x128xf32>
    %29 = vector.extract_strided_slice %22 {offsets = [0, 128], sizes = [8, 128], strides = [1, 1]} : vector<8x512xf32> to vector<8x128xf32>
    %30 = arith.negf %29 : vector<8x128xf32>
    %31 = math.exp %30 : vector<8x128xf32>
    %cst_16 = arith.constant 1.000000e+00 : f32
    %32 = vector.broadcast %cst_16 : f32 to vector<8x128xf32>
    %33 = arith.addf %32, %31 : vector<8x128xf32>
    %34 = arith.divf %32, %33 : vector<8x128xf32>
    %35 = vector.extract_strided_slice %22 {offsets = [0, 256], sizes = [8, 128], strides = [1, 1]} : vector<8x512xf32> to vector<8x128xf32>
    %36 = math.tanh %35 : vector<8x128xf32>
    %37 = vector.extract_strided_slice %22 {offsets = [0, 384], sizes = [8, 128], strides = [1, 1]} : vector<8x512xf32> to vector<8x128xf32>
    %38 = arith.negf %37 : vector<8x128xf32>
    %39 = math.exp %38 : vector<8x128xf32>
    %cst_17 = arith.constant 1.000000e+00 : f32
    %40 = vector.broadcast %cst_17 : f32 to vector<8x128xf32>
    %41 = arith.addf %40, %39 : vector<8x128xf32>
    %42 = arith.divf %40, %41 : vector<8x128xf32>
    %c0_18 = arith.constant 0 : index
    %c0_19 = arith.constant 0 : index
    %c0_20 = arith.constant 0 : index
    %43 = vector.load %arg3[%c0_18, %c0_19, %c0_20] : memref<2x8x128xf32, #tpu.memory_space<vmem>>, vector<1x8x128xf32>
    %44 = vector.shape_cast %43 : vector<1x8x128xf32> to vector<8x128xf32>
    %45 = arith.mulf %34, %44 : vector<8x128xf32>
    %46 = arith.mulf %28, %36 : vector<8x128xf32>
    %47 = arith.addf %45, %46 : vector<8x128xf32>
    %48 = math.tanh %47 : vector<8x128xf32>
    %49 = arith.mulf %42, %48 : vector<8x128xf32>
    %c0_21 = arith.constant 0 : index
    %c0_22 = arith.constant 0 : index
    %c0_23 = arith.constant 0 : index
    %50 = vector.load %arg12[%c0_21, %c0_22, %c0_23] : memref<2x8x128xf32, #tpu.memory_space<vmem>>, vector<1x8x128xf32>
    %51 = vector.shape_cast %50 : vector<1x8x128xf32> to vector<8x128xf32>
    %52 = vector.shape_cast %49 : vector<8x128xf32> to vector<1x8x128xf32>
    tpu.vector_store %arg12[%c0_21, %c0_22, %c0_23], %52 {strides = array<i32>} : memref<2x8x128xf32, #tpu.memory_space<vmem>>, vector<1x8x128xf32>,
    %c0_24 = arith.constant 0 : index
    %c0_25 = arith.constant 0 : index
    %c0_26 = arith.constant 0 : index
    %53 = vector.load %arg13[%c0_24, %c0_25, %c0_26] : memref<2x8x128xf32, #tpu.memory_space<vmem>>, vector<1x8x128xf32>
    %54 = vector.shape_cast %53 : vector<1x8x128xf32> to vector<8x128xf32>
    %55 = vector.shape_cast %47 : vector<8x128xf32> to vector<1x8x128xf32>
    tpu.vector_store %arg13[%c0_24, %c0_25, %c0_26], %55 {strides = array<i32>} : memref<2x8x128xf32, #tpu.memory_space<vmem>>, vector<1x8x128xf32>,
    %56 = vector.extract_strided_slice %14 {offsets = [0, 512], sizes = [8, 512], strides = [1, 1]} : vector<8x1024xf32> to vector<8x512xf32>
    %c1 = arith.constant 1 : index
    %c0_27 = arith.constant 0 : index
    %c0_28 = arith.constant 0 : index
    %57 = vector.load %arg2[%c1, %c0_27, %c0_28] : memref<2x8x128xf32, #tpu.memory_space<vmem>>, vector<1x8x128xf32>
    %58 = vector.shape_cast %57 : vector<1x8x128xf32> to vector<8x128xf32>
    %59 = arith.truncf %58 : vector<8x128xf32> to vector<8x128xbf16>
    %c1_29 = arith.constant 1 : index
    %c0_30 = arith.constant 0 : index
    %c0_31 = arith.constant 0 : index
    %60 = vector.load %arg5[%c1_29, %c0_30, %c0_31] : memref<2x128x512xbf16, #tpu.memory_space<vmem>>, vector<1x128x512xbf16>
    %61 = vector.shape_cast %60 : vector<1x128x512xbf16> to vector<128x512xbf16>
    %cst_32 = arith.constant dense<0.000000e+00> : vector<8x512xf32>
    %62 = tpu.matmul %59, %61, %cst_32 {dimension_numbers = #tpu.dot_dimension_numbers<[1], [0], [0], [1], [0, 0, 1, 1], [], []>} : vector<8x128xbf16>, vector<128x512xbf16>, vector<8x512xf32> -> vector<8x512xf32>
    %63 = arith.addf %56, %62 : vector<8x512xf32>
    %64 = vector.extract_strided_slice %63 {offsets = [0, 0], sizes = [8, 128], strides = [1, 1]} : vector<8x512xf32> to vector<8x128xf32>
    %65 = arith.negf %64 : vector<8x128xf32>
    %66 = math.exp %65 : vector<8x128xf32>
    %cst_33 = arith.constant 1.000000e+00 : f32
    %67 = vector.broadcast %cst_33 : f32 to vector<8x128xf32>
    %68 = arith.addf %67, %66 : vector<8x128xf32>
    %69 = arith.divf %67, %68 : vector<8x128xf32>
    %70 = vector.extract_strided_slice %63 {offsets = [0, 128], sizes = [8, 128], strides = [1, 1]} : vector<8x512xf32> to vector<8x128xf32>
    %71 = arith.negf %70 : vector<8x128xf32>
    %72 = math.exp %71 : vector<8x128xf32>
    %cst_34 = arith.constant 1.000000e+00 : f32
    %73 = vector.broadcast %cst_34 : f32 to vector<8x128xf32>
    %74 = arith.addf %73, %72 : vector<8x128xf32>
    %75 = arith.divf %73, %74 : vector<8x128xf32>
    %76 = vector.extract_strided_slice %63 {offsets = [0, 256], sizes = [8, 128], strides = [1, 1]} : vector<8x512xf32> to vector<8x128xf32>
    %77 = math.tanh %76 : vector<8x128xf32>
    %78 = vector.extract_strided_slice %63 {offsets = [0, 384], sizes = [8, 128], strides = [1, 1]} : vector<8x512xf32> to vector<8x128xf32>
    %79 = arith.negf %78 : vector<8x128xf32>
    %80 = math.exp %79 : vector<8x128xf32>
    %cst_35 = arith.constant 1.000000e+00 : f32
    %81 = vector.broadcast %cst_35 : f32 to vector<8x128xf32>
    %82 = arith.addf %81, %80 : vector<8x128xf32>
    %83 = arith.divf %81, %82 : vector<8x128xf32>
    %c1_36 = arith.constant 1 : index
    %c0_37 = arith.constant 0 : index
    %c0_38 = arith.constant 0 : index
    %84 = vector.load %arg3[%c1_36, %c0_37, %c0_38] : memref<2x8x128xf32, #tpu.memory_space<vmem>>, vector<1x8x128xf32>
    %85 = vector.shape_cast %84 : vector<1x8x128xf32> to vector<8x128xf32>
    %86 = arith.mulf %75, %85 : vector<8x128xf32>
    %87 = arith.mulf %69, %77 : vector<8x128xf32>
    %88 = arith.addf %86, %87 : vector<8x128xf32>
    %89 = math.tanh %88 : vector<8x128xf32>
    %90 = arith.mulf %83, %89 : vector<8x128xf32>
    %c1_39 = arith.constant 1 : index
    %c0_40 = arith.constant 0 : index
    %c0_41 = arith.constant 0 : index
    %91 = vector.load %arg12[%c1_39, %c0_40, %c0_41] : memref<2x8x128xf32, #tpu.memory_space<vmem>>, vector<1x8x128xf32>
    %92 = vector.shape_cast %91 : vector<1x8x128xf32> to vector<8x128xf32>
    %93 = vector.shape_cast %90 : vector<8x128xf32> to vector<1x8x128xf32>
    tpu.vector_store %arg12[%c1_39, %c0_40, %c0_41], %93 {strides = array<i32>} : memref<2x8x128xf32, #tpu.memory_space<vmem>>, vector<1x8x128xf32>,
    %c1_42 = arith.constant 1 : index
    %c0_43 = arith.constant 0 : index
    %c0_44 = arith.constant 0 : index
    %94 = vector.load %arg13[%c1_42, %c0_43, %c0_44] : memref<2x8x128xf32, #tpu.memory_space<vmem>>, vector<1x8x128xf32>
    %95 = vector.shape_cast %94 : vector<1x8x128xf32> to vector<8x128xf32>
    %96 = vector.shape_cast %88 : vector<8x128xf32> to vector<1x8x128xf32>
    tpu.vector_store %arg13[%c1_42, %c0_43, %c0_44], %96 {strides = array<i32>} : memref<2x8x128xf32, #tpu.memory_space<vmem>>, vector<1x8x128xf32>,
    %97 = tpu.concatenate %49, %90 in 1 : vector<8x128xf32>, vector<8x128xf32> -> vector<8x256xf32>
    %cst_45 = arith.constant dense<0.000000e+00> : vector<8xf32>
    %98 = vector.multi_reduction <add>, %97, %cst_45 [1] : vector<8x256xf32> to vector<8xf32>
    %99 = vector.shape_cast %98 : vector<8xf32> to vector<8x1xf32>
    %cst_46 = arith.constant 2.560000e+02 : f32
    %100 = vector.broadcast %cst_46 : f32 to vector<8x1xf32>
    %101 = arith.divf %99, %100 : vector<8x1xf32>
    %102 = vector.broadcast %101 : vector<8x1xf32> to vector<8x256xf32>
    %103 = arith.subf %97, %102 : vector<8x256xf32>
    %104 = arith.mulf %103, %103 : vector<8x256xf32>
    %cst_47 = arith.constant dense<0.000000e+00> : vector<8xf32>
    %105 = vector.multi_reduction <add>, %104, %cst_47 [1] : vector<8x256xf32> to vector<8xf32>
    %106 = vector.shape_cast %105 : vector<8xf32> to vector<8x1xf32>
    %cst_48 = arith.constant 2.560000e+02 : f32
    %107 = vector.broadcast %cst_48 : f32 to vector<8x1xf32>
    %108 = arith.divf %106, %107 : vector<8x1xf32>
    %109 = vector.broadcast %101 : vector<8x1xf32> to vector<8x256xf32>
    %110 = arith.subf %97, %109 : vector<8x256xf32>
    %cst_49 = arith.constant 9.99999974E-6 : f32
    %111 = vector.broadcast %cst_49 : f32 to vector<8x1xf32>
    %112 = arith.addf %108, %111 : vector<8x1xf32>
    %113 = math.rsqrt %112 : vector<8x1xf32>
    %114 = vector.broadcast %113 : vector<8x1xf32> to vector<8x256xf32>
    %115 = arith.mulf %110, %114 : vector<8x256xf32>
    %c0_50 = arith.constant 0 : index
    %c0_51 = arith.constant 0 : index
    %116 = vector.load %arg7[%c0_50, %c0_51] : memref<1x256xf32, #tpu.memory_space<vmem>>, vector<1x256xf32>
    %117 = vector.broadcast %116 : vector<1x256xf32> to vector<8x256xf32>
    %118 = arith.mulf %115, %117 : vector<8x256xf32>
    %c0_52 = arith.constant 0 : index
    %c0_53 = arith.constant 0 : index
    %119 = vector.load %arg8[%c0_52, %c0_53] : memref<1x256xf32, #tpu.memory_space<vmem>>, vector<1x256xf32>
    %120 = vector.broadcast %119 : vector<1x256xf32> to vector<8x256xf32>
    %121 = arith.addf %118, %120 : vector<8x256xf32>
    %122 = arith.truncf %121 : vector<8x256xf32> to vector<8x256xbf16>
    %c0_54 = arith.constant 0 : index
    %c0_55 = arith.constant 0 : index
    %123 = vector.load %arg9[%c0_54, %c0_55] : memref<256x256xbf16, #tpu.memory_space<vmem>>, vector<256x256xbf16>
    %cst_56 = arith.constant dense<0.000000e+00> : vector<8x256xf32>
    %124 = tpu.matmul %122, %123, %cst_56 {dimension_numbers = #tpu.dot_dimension_numbers<[1], [0], [0], [1], [0, 0, 1, 1], [], []>} : vector<8x256xbf16>, vector<256x256xbf16>, vector<8x256xf32> -> vector<8x256xf32>
    %c0_57 = arith.constant 0 : index
    %c0_58 = arith.constant 0 : index
    %125 = vector.load %arg10[%c0_57, %c0_58] : memref<1x256xf32, #tpu.memory_space<vmem>>, vector<1x256xf32>
    %126 = vector.broadcast %125 : vector<1x256xf32> to vector<8x256xf32>
    %127 = arith.addf %124, %126 : vector<8x256xf32>
    %c0_59 = arith.constant 0 : index
    %c0_60 = arith.constant 0 : index
    %128 = vector.load %arg11[%c0_59, %c0_60] : memref<8x256xf32, #tpu.memory_space<vmem>>, vector<8x256xf32>
    tpu.vector_store %arg11[%c0_59, %c0_60], %127 {strides = array<i32>} : memref<8x256xf32, #tpu.memory_space<vmem>>, vector<8x256xf32>,
    return
  }
}

</mosaic_0001>

<bundles_post_ra>
// kernel: rnn_v2_forward.1
= control target key start
LH: loop header
LB: loop body
LE: loop exit
PB: predicated region body
PF: predicated region fallthrough
CT: control target
= control target key end

     0   :  { %19 = vsyncpa [#allocation3], 0  ;;  %s2792_s0 = inlined_call_operand.vmem [shape: s32[8,1], index: 0, kind: input, shape index: {}]   ;;  %s2793_s1 = inlined_call_operand.hbm [shape: bf16[256,128], index: 1, kind: input, shape index: {}]   ;;  %s2794_s2 = inlined_call_operand.hbm [shape: f32[2,8,128], index: 2, kind: input, shape index: {}, may-alias: {2,12}]   ;;  %s2795_s3 = inlined_call_operand.hbm [shape: f32[2,8,128], index: 3, kind: input, shape index: {}, may-alias: {3,13}]   ;;  %s2796_s4 = inlined_call_operand.hbm [shape: bf16[128,1024], index: 4, kind: input, shape index: {}]   ;;  %s2797_s5 = inlined_call_operand.hbm [shape: bf16[2,128,512], index: 5, kind: input, shape index: {}]   ;;  %s2798_s6 = inlined_call_operand.vmem [shape: f32[1,1024], index: 6, kind: input, shape index: {}]   ;;  %s2799_s7 = inlined_call_operand.vmem [shape: f32[1,256], index: 7, kind: input, shape index: {}]   ;;  %s2800_s8 = inlined_call_operand.vmem [shape: f32[1,256], index: 8, kind: input, shape index: {}]   ;;  %s2801_s9 = inlined_call_operand.hbm [shape: bf16[256,256], index: 9, kind: input, shape index: {}]   ;;  %s2802_s10 = inlined_call_operand.vmem [shape: f32[1,256], index: 10, kind: input, shape index: {}]   ;;  %s2803_s11 = inlined_call_operand.hbm [shape: f32[8,256], index: 11, kind: output, shape index: {0}]   ;;  %s2804_s12 = inlined_call_operand.hbm [shape: f32[2,8,128], index: 12, kind: output, shape index: {1}, may-alias: {2,12}]   ;;  %s2805_s13 = inlined_call_operand.hbm [shape: f32[2,8,128], index: 13, kind: output, shape index: {2}, may-alias: {3,13}]  }
   0x1   :  { %20 = vsyncpa [#allocation6], 0 }
   0x2   :  { %21 = vsyncpa [#allocation9], 0 }
   0x3   :  { %22 = vsyncpa [#allocation12], 0 }
   0x4   :  { %23 = vsyncpa [#allocation4], 0 }
   0x5   :  { %24 = vsyncpa [#allocation15], 0  ;;  %s2520_s25 = smov [#allocation5]   ;;  %s2310_s29 = scalar_lea.hbm %s2794_s2, 256 }
   0x6   :  { %s44_s26 = sshll.u32 %s2520_s25, 4  ;;  %p2311_p0 = scmp.ne.s32.totalorder %s2794_s2, %s2310_s29  ;;  %s45_s26 = int_to_ptr.vmem [resolvable:$true] %s44_s26 }
   0x7   :  { %p2314_p1 = scmp.lt.u32.totalorder %s2310_s29, %s2794_s2 }
   0x9   :  { %p2316_p2 = pnand %p2314_p1, %p2311_p0 }
   0xb   :  { %2319 = shalt.err (!%p2316_p2)
}
   0xc   :  { %s2320_s17 = scalar_lea.vmem %s45_s26, 256  ;;  %p2325_p4 = scmp.lt.s32.totalorder %s45_s26, %s45_s26 }
   0xd   :  { %p2321_p3 = scmp.ne.s32.totalorder %s45_s26, %s2320_s17  ;;  %p2326_p5 = scmp.lt.s32.totalorder %s2320_s17, %s2320_s17 }
   0xf   :  { %p2327_p6 = por %p2326_p5, %p2325_p4 }
  0x11   :  { %p2328_p7 = pnand %p2327_p6, %p2321_p3 }
  0x13   :  { %2331 = shalt.err (!%p2328_p7)
}
  0x14   :  { %s2521_s18 = smov 128   ;;  %s2522_s19 = smov 8  }
  0x15   :  { %50 = dma.hbm_to_vmem [thread:$0]  %s2794_s2, 256, %s45_s26, [#allocation6], %s2521_s18, %s2521_s18, %s2522_s19  }
  0x16   :  { %s2523_s22 = smov [#allocation8]   ;;  %s2332_s27 = scalar_lea.hbm %s2796_s4, 8192 }
  0x17   :  { %s68_s23 = sshll.u32 %s2523_s22, 4  ;;  %p2333_p8 = scmp.ne.s32.totalorder %s2796_s4, %s2332_s27  ;;  %s69_s23 = int_to_ptr.vmem [resolvable:$true] %s68_s23 }
  0x18   :  { %p2336_p9 = scmp.lt.u32.totalorder %s2332_s27, %s2796_s4 }
  0x1a   :  { %p2338_p10 = pnand %p2336_p9, %p2333_p8 }
  0x1c   :  { %2341 = shalt.err (!%p2338_p10)
}
  0x1d   :  { %s2342_s15 = scalar_lea.vmem %s69_s23, 8192  ;;  %p2347_p12 = scmp.lt.s32.totalorder %s69_s23, %s69_s23 }
  0x1e   :  { %p2343_p11 = scmp.ne.s32.totalorder %s69_s23, %s2342_s15  ;;  %p2348_p13 = scmp.lt.s32.totalorder %s2342_s15, %s2342_s15 }
  0x20   :  { %p2349_p0 = por %p2348_p13, %p2347_p12 }
  0x22   :  { %p2350_p1 = pnand %p2349_p0, %p2343_p11 }
  0x24   :  { %2353 = shalt.err (!%p2350_p1)
}
  0x25   :  { %s2524_s2 = smov 512   ;;  %s2525_s26 = smov 32  }
  0x26   :  { %74 = dma.hbm_to_vmem [thread:$0]  %s2796_s4, 8192, %s69_s23, [#allocation9], %s2524_s2, %s2524_s2, %s2525_s26  }
  0x27   :  { %s2526_s20 = smov [#allocation2]   ;;  %s2354_s25 = scalar_lea.hbm %s2793_s1, 2048 }
  0x28   :  { %s32_s21 = sshll.u32 %s2526_s20, 4  ;;  %p2355_p2 = scmp.ne.s32.totalorder %s2793_s1, %s2354_s25  ;;  %s33_s21 = int_to_ptr.vmem [resolvable:$true] %s32_s21 }
  0x29   :  { %p2358_p3 = scmp.lt.u32.totalorder %s2354_s25, %s2793_s1 }
  0x2b   :  { %p2360_p4 = pnand %p2358_p3, %p2355_p2 }
  0x2d   :  { %2363 = shalt.err (!%p2360_p4)
}
  0x2e   :  { %s2364_s14 = scalar_lea.vmem %s33_s21, 2048  ;;  %p2369_p6 = scmp.lt.s32.totalorder %s33_s21, %s33_s21 }
  0x2f   :  { %p2365_p5 = scmp.ne.s32.totalorder %s33_s21, %s2364_s14  ;;  %p2370_p7 = scmp.lt.s32.totalorder %s2364_s14, %s2364_s14 }
  0x31   :  { %p2371_p8 = por %p2370_p7, %p2369_p6 }
  0x33   :  { %p2372_p9 = pnand %p2371_p8, %p2365_p5 }
  0x35   :  { %2375 = shalt.err (!%p2372_p9)
}
  0x36   :  { %s2527_s4 = smov 64   ;;  %s2528_s23 = smov 4  }
  0x37   :  { %38 = dma.hbm_to_vmem [thread:$0]  %s2793_s1, 2048, %s33_s21, [#allocation3], %s2527_s4, %s2527_s4, %s2528_s23  }
  0x38   :  { %s2529_s26 = smov [#allocation7]   ;;  %s2530_s17 = smov [#allocation10]  }
  0x39   :  { %s56_s16 = sshll.u32 %s2529_s26, 4  ;;  %s80_s20 = sshll.u32 %s2530_s17, 4  ;;  %s57_s16 = int_to_ptr.vmem [resolvable:$true] %s56_s16  ;;  %s81_s20 = int_to_ptr.vmem [resolvable:$true] %s80_s20 }
  0x3a   :  { %s2376_s25 = scalar_lea.hbm %s2795_s3, 256 }
  0x3b   :  { %p2377_p10 = scmp.ne.s32.totalorder %s2795_s3, %s2376_s25  ;;  %p2380_p11 = scmp.lt.u32.totalorder %s2376_s25, %s2795_s3 }
  0x3d   :  { %p2382_p12 = pnand %p2380_p11, %p2377_p10 }
  0x3f   :  { %2385 = shalt.err (!%p2382_p12)
}
  0x40   :  { %s2386_s1 = scalar_lea.vmem %s57_s16, 256  ;;  %p2391_p0 = scmp.lt.s32.totalorder %s57_s16, %s57_s16 }
  0x41   :  { %p2387_p13 = scmp.ne.s32.totalorder %s57_s16, %s2386_s1  ;;  %p2392_p1 = scmp.lt.s32.totalorder %s2386_s1, %s2386_s1 }
  0x43   :  { %p2393_p2 = por %p2392_p1, %p2391_p0 }
  0x45   :  { %p2394_p3 = pnand %p2393_p2, %p2387_p13 }
  0x47   :  { %2397 = shalt.err (!%p2394_p3)
}
  0x48   :  { %62 = dma.hbm_to_vmem [thread:$0]  %s2795_s3, 256, %s57_s16, [#allocation6], %s2521_s18, %s2521_s18, %s2522_s19  }
  0x49   :  { %s2398_s15 = scalar_lea.hbm %s2797_s5, 8192 }
  0x4a   :  { %p2399_p4 = scmp.ne.s32.totalorder %s2797_s5, %s2398_s15  ;;  %p2402_p5 = scmp.lt.u32.totalorder %s2398_s15, %s2797_s5 }
  0x4c   :  { %p2404_p6 = pnand %p2402_p5, %p2399_p4 }
  0x4e   :  { %2407 = shalt.err (!%p2404_p6)
}
  0x4f   :  { %s2408_s24 = scalar_lea.vmem %s81_s20, 8192  ;;  %p2413_p8 = scmp.lt.s32.totalorder %s81_s20, %s81_s20 }
  0x50   :  { %p2409_p7 = scmp.ne.s32.totalorder %s81_s20, %s2408_s24  ;;  %p2414_p9 = scmp.lt.s32.totalorder %s2408_s24, %s2408_s24 }
  0x52   :  { %p2415_p10 = por %p2414_p9, %p2413_p8 }
  0x54   :  { %p2416_p11 = pnand %p2415_p10, %p2409_p7 }
  0x56   :  { %2419 = shalt.err (!%p2416_p11)
}
  0x57   :  { %s2531_s3 = smov 256   ;;  %s2532_s16 = smov 16  }
  0x58   :  { %86 = dma.hbm_to_vmem [thread:$0]  %s2797_s5, 8192, %s81_s20, [#allocation9], %s2531_s3, %s2531_s3, %s2532_s16  }
  0x59   :  { %s2533_s28 = smov [#allocation11]   ;;  %s2420_s21 = scalar_lea.hbm %s2801_s9, 4096 }
  0x5a   :  { %s98_s29 = sshll.u32 %s2533_s28, 4  ;;  %p2421_p12 = scmp.ne.s32.totalorder %s2801_s9, %s2420_s21  ;;  %s99_s29 = int_to_ptr.vmem [resolvable:$true] %s98_s29 }
  0x5b   :  { %p2424_p13 = scmp.lt.u32.totalorder %s2420_s21, %s2801_s9 }
  0x5d   :  { %p2426_p0 = pnand %p2424_p13, %p2421_p12 }
  0x5f   :  { %2429 = shalt.err (!%p2426_p0)
}
  0x60   :  { %s2430_s2 = scalar_lea.vmem %s99_s29, 4096  ;;  %p2435_p2 = scmp.lt.s32.totalorder %s99_s29, %s99_s29 }
  0x61   :  { %p2431_p1 = scmp.ne.s32.totalorder %s99_s29, %s2430_s2  ;;  %p2436_p3 = scmp.lt.s32.totalorder %s2430_s2, %s2430_s2 }
  0x63   :  { %p2437_p4 = por %p2436_p3, %p2435_p2 }
  0x65   :  { %p2438_p5 = pnand %p2437_p4, %p2431_p1 }
  0x67   :  { %2441 = shalt.err (!%p2438_p5)
}
  0x68   :  { %104 = dma.hbm_to_vmem [thread:$0]  %s2801_s9, 4096, %s99_s29, [#allocation12], %s2521_s18, %s2521_s18, %s2522_s19  }
  0x69   :  { %2508 = dma.done.wait [#allocation3], 2048  }
  0x6a   :  { %2509 = vsyncadd [#allocation3], 4294965248 }
  0x6b   :  { %2510 = dma.done.wait [#allocation6], 512  }
  0x6c   :  { %2511 = vsyncadd [#allocation6], 4294966784 }
  0x6d   :  { %2512 = dma.done.wait [#allocation9], 16384  }
  0x6e   :  { %2513 = vsyncadd [#allocation9], 4294950912 }
  0x6f   :  { %2514 = dma.done.wait [#allocation12], 4096  }
  0x70   :  { %2515 = vsyncadd [#allocation12], 4294963200  ;;  %v2534_v0 = vmov 0   ;;  %v126_v1 = vld [vmem:[%s2792_s0] sm:$0xff]  ;;  %v2118_v4 = vld [vmem:[#allocation2 + $0x48] sm:$0xff]   ;;  %v127_v50 = vlaneseq }
  0x71   :  { %2115 = vset.pattern.permute.xlu0 %v2534_v0  ;;  %768 = vmatprep.mubr.bf16.mxu1 %v2534_v0  ;;  %v2116_v2 = vld [vmem:[#allocation2 + $0x40] sm:$0xff]   ;;  %v2119_v5 = vld [vmem:[#allocation2 + $0x8] sm:$0xff]   ;;  %v2120_v6 = vld [vmem:[#allocation2 + $0x50] sm:$0xff]   ;;  %v2535_v57 = vmov 1.0|1.0  }
  0x72   :  { %131 = vperm.xlu0 %2115, %v126_v1   ;;  %v2117_v3 = vld [vmem:[#allocation2] sm:$0xff]   ;;  %2050 = vmatprep.subr.bf16.mxu0 %v2116_v2  ;;  %v2121_v7 = vld [vmem:[#allocation2 + $0x10] sm:$0xff]   ;;  %v2122_v8 = vld [vmem:[#allocation2 + $0x58] sm:$0xff]   ;;  %v128_v51 = vand.u32 127, %v127_v50 }
  0x73   :  { %2051 = vmatpush3.bf16.msra.mxu0 %v2117_v3  ;;  %v2123_v9 = vld [vmem:[#allocation2 + $0x18] sm:$0xff]   ;;  %v2124_v10 = vld [vmem:[#allocation2 + $0x60] sm:$0xff]   ;;  %v2126_v12 = vld [vmem:[#allocation2 + $0x68] sm:$0xff]  }
  0x74   :  { %2052 = vmatprep.subr.bf16.mxu0 %v2118_v4  ;;  %v2125_v11 = vld [vmem:[#allocation2 + $0x20] sm:$0xff]   ;;  %v2695_v16 = vld [vmem:[#allocation8 + $0x8] sm:$0xff]  ;;  %v2128_v27 = vld [vmem:[#allocation2 + $0x70] sm:$0xff]   ;;  %v129_v52 = vadd.s32 128, %v128_v51 }
  0x75   :  { %v310_v13 = vld [vmem:[#allocation8] sm:$0xff]  ;;  %v2697_v17 = vld [vmem:[#allocation8 + $0x28] sm:$0xff]  ;;  %v2129_v31 = vld [vmem:[#allocation2 + $0x30] sm:$0xff]  }
  0x76   :  { %v314_v14 = vld [vmem:[#allocation8 + $0x20] sm:$0xff]  ;;  %v1886_v20 = vcombine.low %v2695_v16, %v2697_v17  ;;  %v2127_v25 = vld [vmem:[#allocation2 + $0x28] sm:$0xff]   ;;  %v2130_v32 = vld [vmem:[#allocation2 + $0x78] sm:$0xff]   ;;  %v1887_v41 = vcombine.high %v2695_v16, %v2697_v17 }
  0x77   :  { %2053 = vmatpush3.bf16.msra.mxu0 %v2119_v5  ;;  %v1885_v15 = vcombine.high %v310_v13, %v314_v14  ;;  %v1884_v18 = vcombine.low %v310_v13, %v314_v14  ;;  %v318_v19 = vld [vmem:[#allocation8 + $0x40] sm:$0xff]  ;;  %v2131_v37 = vld [vmem:[#allocation2 + $0x38] sm:$0xff]   ;;  %v319_v54 = vld [vmem:[#allocation8 + $0x48] sm:$0xff] }
  0x78   :  { %2054 = vmatprep.subr.bf16.mxu0 %v2120_v6  ;;  %v322_v21 = vld [vmem:[#allocation8 + $0x60] sm:$0xff]  ;;  %v323_v55 = vld [vmem:[#allocation8 + $0x68] sm:$0xff] }
  0x79   :  { %736 = vmatprep.subr.bf16.mxu1 %v1885_v15  ;;  %v1893_v22 = vcombine.high %v318_v19, %v322_v21  ;;  %v326_v23 = vld [vmem:[#allocation8 + $0x80] sm:$0xff]  ;;  %v1892_v26 = vcombine.low %v318_v19, %v322_v21  ;;  %v1895_v56 = vcombine.high %v319_v54, %v323_v55  ;;  %v327_v58 = vld [vmem:[#allocation8 + $0x88] sm:$0xff]  ;;  %v1894_v60 = vcombine.low %v319_v54, %v323_v55  ;;  %v340_v54 = vld [vmem:[#allocation8 + $0xf0] sm:$0xff] }
  0x7a   :  { %v330_v24 = vld [vmem:[#allocation8 + $0xa0] sm:$0xff]  ;;  %737 = vmatpush1.bf16.msra.mxu1 %v1884_v18  ;;  %v331_v59 = vld [vmem:[#allocation8 + $0xa8] sm:$0xff]  ;;  %v337_v55 = vld [vmem:[#allocation8 + $0xd8] sm:$0xff] }
  0x7b   :  { %2055 = vmatpush3.bf16.msra.mxu0 %v2121_v7  ;;  %738 = vmatprep.subr.bf16.mxu1 %v1893_v22  ;;  %v1901_v28 = vcombine.high %v326_v23, %v330_v24  ;;  %v334_v29 = vld [vmem:[#allocation8 + $0xc0] sm:$0xff]  ;;  %v1900_v33 = vcombine.low %v326_v23, %v330_v24  ;;  %v1903_v61 = vcombine.high %v327_v58, %v331_v59  ;;  %v335_v62 = vld [vmem:[#allocation8 + $0xc8] sm:$0xff]  ;;  %v312_v24 = vld [vmem:[#allocation8 + $0x10] sm:$0xff] }
  0x7c   :  { %2056 = vmatprep.subr.bf16.mxu0 %v2122_v8  ;;  %v338_v30 = vld [vmem:[#allocation8 + $0xe0] sm:$0xff]  ;;  %v339_v63 = vld [vmem:[#allocation8 + $0xe8] sm:$0xff]  ;;  %v1902_v1 = vcombine.low %v327_v58, %v331_v59 }
  0x7d   :  { %v1909_v34 = vcombine.high %v334_v29, %v338_v30  ;;  %v342_v35 = vld [vmem:[#allocation8 + $0x100] sm:$0xff]  ;;  %v1908_v38 = vcombine.low %v334_v29, %v338_v30  ;;  %v1911_v2 = vcombine.high %v335_v62, %v339_v63  ;;  %v343_v3 = vld [vmem:[#allocation8 + $0x108] sm:$0xff]  ;;  %v1910_v5 = vcombine.low %v335_v62, %v339_v63  ;;  %v348_v62 = vld [vmem:[#allocation8 + $0x130] sm:$0xff] }
  0x7e   :  { %739 = vmatpush1.bf16.msra.mxu1 %v1892_v26  ;;  %v346_v36 = vld [vmem:[#allocation8 + $0x120] sm:$0xff]  ;;  %v347_v4 = vld [vmem:[#allocation8 + $0x128] sm:$0xff]  ;;  %v313_v26 = vld [vmem:[#allocation8 + $0x18] sm:$0xff] }
  0x7f   :  { %2057 = vmatpush3.bf16.msra.mxu0 %v2123_v9  ;;  %740 = vmatprep.subr.bf16.mxu1 %v1901_v28  ;;  %v350_v39 = vld [vmem:[#allocation8 + $0x140] sm:$0xff]  ;;  %v1917_v42 = vcombine.high %v342_v35, %v346_v36  ;;  %v1916_v43 = vcombine.low %v342_v35, %v346_v36  ;;  %v1919_v6 = vcombine.high %v343_v3, %v347_v4  ;;  %v351_v7 = vld [vmem:[#allocation8 + $0x148] sm:$0xff]  ;;  %v317_v28 = vld [vmem:[#allocation8 + $0x38] sm:$0xff] }
  0x80   :  { %2058 = vmatprep.subr.bf16.mxu0 %v2124_v10  ;;  %v354_v40 = vld [vmem:[#allocation8 + $0x160] sm:$0xff]  ;;  %v355_v8 = vld [vmem:[#allocation8 + $0x168] sm:$0xff]  ;;  %v1918_v9 = vcombine.low %v343_v3, %v347_v4  ;;  %v1890_v30 = vcombine.low %v313_v26, %v317_v28  ;;  %v324_v35 = vld [vmem:[#allocation8 + $0x70] sm:$0xff] }
  0x81   :  { %v358_v44 = vld [vmem:[#allocation8 + $0x180] sm:$0xff]  ;;  %v1925_v46 = vcombine.high %v350_v39, %v354_v40  ;;  %v1924_v47 = vcombine.low %v350_v39, %v354_v40  ;;  %v1927_v10 = vcombine.high %v351_v7, %v355_v8  ;;  %v1926_v13 = vcombine.low %v351_v7, %v355_v8  ;;  %v367_v18 = vld [vmem:[#allocation8 + $0x1c8] sm:$0xff]  ;;  %v321_v36 = vld [vmem:[#allocation8 + $0x58] sm:$0xff] }
  0x82   :  { %741 = vmatpush1.bf16.msra.mxu1 %v1900_v33  ;;  %v362_v45 = vld [vmem:[#allocation8 + $0x1a0] sm:$0xff]  ;;  %v320_v33 = vld [vmem:[#allocation8 + $0x50] sm:$0xff]  ;;  %v345_v63 = vld [vmem:[#allocation8 + $0x118] sm:$0xff] }
  0x83   :  { %2059 = vmatpush3.bf16.msra.mxu0 %v2125_v11  ;;  %742 = vmatprep.subr.bf16.mxu1 %v1909_v34  ;;  %v1933_v48 = vcombine.high %v358_v44, %v362_v45  ;;  %v1932_v49 = vcombine.low %v358_v44, %v362_v45  ;;  %v359_v11 = vld [vmem:[#allocation8 + $0x188] sm:$0xff]  ;;  %v366_v16 = vld [vmem:[#allocation8 + $0x1c0] sm:$0xff]  ;;  %v328_v44 = vld [vmem:[#allocation8 + $0x90] sm:$0xff] }
  0x84   :  { %2060 = vmatprep.subr.bf16.mxu0 %v2126_v12  ;;  %v363_v12 = vld [vmem:[#allocation8 + $0x1a8] sm:$0xff]  ;;  %v370_v17 = vld [vmem:[#allocation8 + $0x1e0] sm:$0xff]  ;;  %v332_v45 = vld [vmem:[#allocation8 + $0xb0] sm:$0xff] }
  0x85   :  { %v1935_v14 = vcombine.high %v359_v11, %v363_v12  ;;  %v1934_v15 = vcombine.low %v359_v11, %v363_v12  ;;  %v1941_v19 = vcombine.high %v366_v16, %v370_v17  ;;  %v1940_v23 = vcombine.low %v366_v16, %v370_v17  ;;  %v356_v7 = vld [vmem:[#allocation8 + $0x170] sm:$0xff]  ;;  %v353_v8 = vld [vmem:[#allocation8 + $0x158] sm:$0xff] }
  0x86   :  { %743 = vmatpush1.bf16.msra.mxu1 %v1908_v38  ;;  %v361_v16 = vld [vmem:[#allocation8 + $0x198] sm:$0xff] }
  0x87   :  { %2061 = vmatpush3.bf16.msra.mxu0 %v2127_v25  ;;  %744 = vmatprep.subr.bf16.mxu1 %v1917_v42  ;;  %v316_v25 = vld [vmem:[#allocation8 + $0x30] sm:$0xff]  ;;  %v1897_v42 = vcombine.high %v320_v33, %v324_v35  ;;  %v365_v17 = vld [vmem:[#allocation8 + $0x1b8] sm:$0xff] }
  0x88   :  { %2062 = vmatprep.subr.bf16.mxu0 %v2128_v27  ;;  %v1889_v27 = vcombine.high %v312_v24, %v316_v25  ;;  %v1888_v29 = vcombine.low %v312_v24, %v316_v25  ;;  %v369_v24 = vld [vmem:[#allocation8 + $0x1d8] sm:$0xff] }
  0x89   :  { %v373_v25 = vld [vmem:[#allocation8 + $0x1f8] sm:$0xff] }
  0x8a   :  { %745 = vmatpush1.bf16.msra.mxu1 %v1916_v43 }
  0x8b   :  { %2063 = vmatpush3.bf16.msra.mxu0 %v2129_v31  ;;  %746 = vmatprep.subr.bf16.mxu1 %v1925_v46  ;;  %v1891_v31 = vcombine.high %v313_v26, %v317_v28  ;;  %v329_v46 = vld [vmem:[#allocation8 + $0x98] sm:$0xff] }
  0x8c   :  { %2064 = vmatprep.subr.bf16.mxu0 %v2130_v32 }
  0x8e   :  { %747 = vmatpush1.bf16.msra.mxu1 %v1924_v47  ;;  %v333_v47 = vld [vmem:[#allocation8 + $0xb8] sm:$0xff] }
  0x8f   :  { %2065 = vmatpush3.bf16.msra.mxu0 %v2131_v37  ;;  %748 = vmatprep.subr.bf16.mxu1 %v1933_v48  ;;  %v325_v37 = vld [vmem:[#allocation8 + $0x78] sm:$0xff]  ;;  %v1896_v48 = vcombine.low %v320_v33, %v324_v35  ;;  %v1906_v58 = vcombine.low %v329_v46, %v333_v47 }
  0x90   :  { %777 = vmatprep.subr.bf16.mxu0 %v1887_v41  ;;  %v1899_v43 = vcombine.high %v321_v36, %v325_v37  ;;  %v2137_v33 = vld [vmem:[#allocation10 + $0xc] ss:$16 sps:$4 sm:$0xff]   ;;  %v2135_v35 = vld [vmem:[#allocation10 + $0x8] ss:$16 sps:$4 sm:$0xff]  }
  0x92   :  { %749 = vmatpush1.bf16.msra.mxu1 %v1932_v49  ;;  %v1898_v49 = vcombine.low %v321_v36, %v325_v37  ;;  %v2140_v36 = vld [vmem:[#allocation10 + $0x24] ss:$16 sps:$4 sm:$0xff]   ;;  %v2143_v37 = vld [vmem:[#allocation10 + $0x2c] ss:$16 sps:$4 sm:$0xff]  }
  0x93   :  { %750 = vmatprep.subr.bf16.mxu1 %v1941_v19 }
  0x96   :  { %751 = vmatpush1.bf16.msra.mxu1 %v1940_v23  ;;  %v372_v23 = vld [vmem:[#allocation8 + $0x1f0] sm:$0xff] }
  0x97   :  { %818 = vmatprep.subr.bf16.mxu1 %v1889_v27  ;;  %v1938_v27 = vcombine.low %v361_v16, %v365_v17 }
  0xf1   :  { %v132_v53 = vpop.permute.xlu0 %131 }
  0xf2   :  { %vm133_vm0 = vcmp.eq.s32.totalorder %v132_v53, %v128_v51  ;;  %vm134_vm1 = vcmp.eq.s32.totalorder %v132_v53, %v129_v52  ;;  %v1905_v51 = vcombine.high %v328_v44, %v332_v45  ;;  %v1907_v52 = vcombine.high %v329_v46, %v333_v47  ;;  %v336_v53 = vld [vmem:[#allocation8 + $0xd0] sm:$0xff]  ;;  %v2153_v47 = vld [vmem:[#allocation10 + $0x68] ss:$16 sps:$4 sm:$0xff]  }
  0xf3   :  { %vm1882_vm2 = vmpackc.low %vm133_vm0, %vm133_vm0  ;;  %v1913_v59 = vcombine.high %v336_v53, %v340_v54  ;;  %v2150_v46 = vld [vmem:[#allocation10 + $0x60] ss:$16 sps:$4 sm:$0xff]  }
  0xf4   :  { %vm1880_vm3 = vmpackc.low %vm134_vm1, %vm134_vm1 }
  0xf5   :  { %1881 = vmatprep.mubr.msk.bf16.mxu0 %vm1880_vm3, %v2535_v57 }
  0xf6   :  { %1883 = vmatmul.mubr.msk.bf16.vlgmr.msra.gmra.mrb[0].mxu0 %vm1882_vm2, %v2535_v57  ;;  %v1904_v57 = vcombine.low %v328_v44, %v332_v45  ;;  %v2147_v44 = vld [vmem:[#allocation10 + $0x48] ss:$16 sps:$4 sm:$0xff]   ;;  %v2152_v45 = vld [vmem:[#allocation10 + $0x64] ss:$16 sps:$4 sm:$0xff]  }
  0xf7   :  { %778 = vmatpush1.bf16.msra.mxu0 %v1886_v20  ;;  %809 = vmatprep.mubr.bf16.mxu0 %v2534_v0  ;;  %v371_v20 = vld [vmem:[#allocation8 + $0x1e8] sm:$0xff] }
  0xf8   :  { %779 = vmatprep.subr.bf16.mxu0 %v1895_v56  ;;  %v1942_v21 = vcombine.low %v367_v18, %v371_v20  ;;  %v1943_v22 = vcombine.high %v367_v18, %v371_v20  ;;  %v341_v56 = vld [vmem:[#allocation8 + $0xf8] sm:$0xff] }
  0xf9   :  { %v1914_v3 = vcombine.low %v337_v55, %v341_v56 }
  0xfb   :  { %780 = vmatpush1.bf16.msra.mxu0 %v1894_v60  ;;  %v1915_v60 = vcombine.high %v337_v55, %v341_v56  ;;  %v2162_v55 = vld [vmem:[#allocation10 + $0xa0] ss:$16 sps:$4 sm:$0xff]   ;;  %v2165_v56 = vld [vmem:[#allocation10 + $0xa8] ss:$16 sps:$4 sm:$0xff]  }
  0xfc   :  { %781 = vmatprep.subr.bf16.mxu0 %v1903_v61  ;;  %v344_v61 = vld [vmem:[#allocation8 + $0x110] sm:$0xff] }
  0xfd   :  { %v1921_v4 = vcombine.high %v344_v61, %v348_v62 }
  0xff   :  { %782 = vmatpush1.bf16.msra.mxu0 %v1902_v1  ;;  %v349_v1 = vld [vmem:[#allocation8 + $0x138] sm:$0xff] }
 0x100   :  { %783 = vmatprep.subr.bf16.mxu0 %v1911_v2  ;;  %v1912_v2 = vcombine.low %v336_v53, %v340_v54  ;;  %v1922_v11 = vcombine.low %v345_v63, %v349_v1  ;;  %v2164_v53 = vld [vmem:[#allocation10 + $0xa4] ss:$16 sps:$4 sm:$0xff]   ;;  %v2167_v54 = vld [vmem:[#allocation10 + $0xac] ss:$16 sps:$4 sm:$0xff]  }
 0x103   :  { %784 = vmatpush1.bf16.msra.mxu0 %v1910_v5  ;;  %v1923_v5 = vcombine.high %v345_v63, %v349_v1  ;;  %v2174_v63 = vld [vmem:[#allocation10 + $0xe0] ss:$16 sps:$4 sm:$0xff]   ;;  %v2177_v1 = vld [vmem:[#allocation10 + $0xe8] ss:$16 sps:$4 sm:$0xff]  }
 0x104   :  { %785 = vmatprep.subr.bf16.mxu0 %v1919_v6  ;;  %v352_v6 = vld [vmem:[#allocation8 + $0x150] sm:$0xff] }
 0x105   :  { %v1929_v12 = vcombine.high %v352_v6, %v356_v7  ;;  %v1928_v18 = vcombine.low %v352_v6, %v356_v7  ;;  %v2180_v6 = vld [vmem:[#allocation10 + $0x100] ss:$16 sps:$4 sm:$0xff]   ;;  %v2183_v7 = vld [vmem:[#allocation10 + $0x108] ss:$16 sps:$4 sm:$0xff]  }
 0x107   :  { %786 = vmatpush1.bf16.msra.mxu0 %v1918_v9  ;;  %v357_v9 = vld [vmem:[#allocation8 + $0x178] sm:$0xff] }
 0x108   :  { %787 = vmatprep.subr.bf16.mxu0 %v1927_v10  ;;  %v1920_v10 = vcombine.low %v344_v61, %v348_v62  ;;  %v1930_v19 = vcombine.low %v353_v8, %v357_v9  ;;  %v2176_v61 = vld [vmem:[#allocation10 + $0xe4] ss:$16 sps:$4 sm:$0xff]   ;;  %v2179_v62 = vld [vmem:[#allocation10 + $0xec] ss:$16 sps:$4 sm:$0xff]  }
 0x10b   :  { %788 = vmatpush1.bf16.msra.mxu0 %v1926_v13  ;;  %v1931_v13 = vcombine.high %v353_v8, %v357_v9  ;;  %v2188_v8 = vld [vmem:[#allocation10 + $0x124] ss:$16 sps:$4 sm:$0xff]   ;;  %v2191_v9 = vld [vmem:[#allocation10 + $0x12c] ss:$16 sps:$4 sm:$0xff]  }
 0x10c   :  { %789 = vmatprep.subr.bf16.mxu0 %v1935_v14  ;;  %v360_v14 = vld [vmem:[#allocation8 + $0x190] sm:$0xff] }
 0x10f   :  { %790 = vmatpush1.bf16.msra.mxu0 %v1934_v15  ;;  %v364_v15 = vld [vmem:[#allocation8 + $0x1b0] sm:$0xff] }
 0x110   :  { %791 = vmatprep.subr.bf16.mxu0 %v1943_v22  ;;  %v1937_v20 = vcombine.high %v360_v14, %v364_v15  ;;  %v368_v22 = vld [vmem:[#allocation8 + $0x1d0] sm:$0xff]  ;;  %v1936_v26 = vcombine.low %v360_v14, %v364_v15  ;;  %v2195_v15 = vld [vmem:[#allocation10 + $0x148] ss:$16 sps:$4 sm:$0xff]  }
 0x111   :  { %v1945_v28 = vcombine.high %v368_v22, %v372_v23  ;;  %v2192_v14 = vld [vmem:[#allocation10 + $0x140] ss:$16 sps:$4 sm:$0xff]  }
 0x113   :  { %792 = vmatpush1.bf16.msra.mxu0 %v1942_v21  ;;  %v1939_v21 = vcombine.high %v361_v16, %v365_v17  ;;  %v2200_v16 = vld [vmem:[#allocation10 + $0x164] ss:$16 sps:$4 sm:$0xff]   ;;  %v2203_v17 = vld [vmem:[#allocation10 + $0x16c] ss:$16 sps:$4 sm:$0xff]  }
 0x114   :  { %859 = vmatprep.subr.bf16.mxu0 %v1891_v31  ;;  %v1946_v31 = vcombine.low %v369_v24, %v373_v25 }
 0x1c9   :  { %v2066_v32 = vpop.f32.mrb[0].mxu0 }
 0x1ca   :  { %v2067_v34 = vpop.f32.mrb[1].mxu0 }
 0x1cb   :  { %v2068_v38 = vadd.f32 %v2067_v34, %v2066_v32  ;;  %v2069_v39 = vpop.f32.mrb[2].mxu0  ;;  %v2134_v32 = vld [vmem:[#allocation10 + $0x4] ss:$16 sps:$4 sm:$0xff]   ;;  %v2132_v34 = vld [vmem:[#allocation10] ss:$16 sps:$4 sm:$0xff]  }
 0x1cc   :  { %v2070_v40 = vpop.f32.mrb[3].mxu0  ;;  %v2141_v39 = vld [vmem:[#allocation10 + $0x28] ss:$16 sps:$4 sm:$0xff]  }
 0x1cd   :  { %v2708_v41 = vpack.c.bf16 %v2068_v38, %v2068_v38  ;;  %v2138_v38 = vld [vmem:[#allocation10 + $0x20] ss:$16 sps:$4 sm:$0xff]   ;;  %v2146_v40 = vld [vmem:[#allocation10 + $0x44] ss:$16 sps:$4 sm:$0xff]  }
 0x1cf   :  { %769 = vmatmul.mubr.bf16.vlgmr.msra.gmra.mrb[0].mxu1 %v2708_v41  ;;  %810 = vmatmul.mubr.bf16.vlgmr.msra.gmra.mrb[4].mxu0 %v2708_v41 }
 0x1d0   :  { %819 = vmatpush1.bf16.msra.mxu1 %v1888_v29  ;;  %860 = vmatpush1.bf16.msra.mxu0 %v1890_v30  ;;  %v1947_v29 = vcombine.high %v369_v24, %v373_v25  ;;  %v1944_v30 = vcombine.low %v368_v22, %v372_v23  ;;  %v2204_v22 = vld [vmem:[#allocation10 + $0x180] ss:$16 sps:$4 sm:$0xff]   ;;  %v2212_v23 = vld [vmem:[#allocation10 + $0x1a4] ss:$16 sps:$4 sm:$0xff]   ;;  %v2215_v24 = vld [vmem:[#allocation10 + $0x1ac] ss:$16 sps:$4 sm:$0xff]  }
 0x1d1   :  { %820 = vmatprep.subr.bf16.mxu1 %v1897_v42  ;;  %861 = vmatprep.subr.bf16.mxu0 %v1899_v43  ;;  %v2149_v42 = vld [vmem:[#allocation10 + $0x4c] ss:$16 sps:$4 sm:$0xff]   ;;  %v2144_v43 = vld [vmem:[#allocation10 + $0x40] ss:$16 sps:$4 sm:$0xff]  }
 0x1d2   :  { %850 = vmatprep.mubr.bf16.mxu1 %v2534_v0  ;;  %891 = vmatprep.mubr.bf16.mxu0 %v2534_v0  ;;  %v2210_v25 = vld [vmem:[#allocation10 + $0x1a0] ss:$16 sps:$4 sm:$0xff]  }
 0x1d4   :  { %821 = vmatpush1.bf16.msra.mxu1 %v1896_v48  ;;  %862 = vmatpush1.bf16.msra.mxu0 %v1898_v49  ;;  %v2158_v48 = vld [vmem:[#allocation10 + $0x84] ss:$16 sps:$4 sm:$0xff]   ;;  %v2161_v49 = vld [vmem:[#allocation10 + $0x8c] ss:$16 sps:$4 sm:$0xff]  }
 0x1d5   :  { %822 = vmatprep.subr.bf16.mxu1 %v1905_v51  ;;  %863 = vmatprep.subr.bf16.mxu0 %v1907_v52  ;;  %v2156_v51 = vld [vmem:[#allocation10 + $0x80] ss:$16 sps:$4 sm:$0xff]   ;;  %v2159_v52 = vld [vmem:[#allocation10 + $0x88] ss:$16 sps:$4 sm:$0xff]  }
 0x1d8   :  { %823 = vmatpush1.bf16.msra.mxu1 %v1904_v57  ;;  %864 = vmatpush1.bf16.msra.mxu0 %v1906_v58  ;;  %v2170_v57 = vld [vmem:[#allocation10 + $0xc4] ss:$16 sps:$4 sm:$0xff]   ;;  %v2173_v58 = vld [vmem:[#allocation10 + $0xcc] ss:$16 sps:$4 sm:$0xff]  }
 0x1d9   :  { %824 = vmatprep.subr.bf16.mxu1 %v1913_v59  ;;  %865 = vmatprep.subr.bf16.mxu0 %v1915_v60  ;;  %v2168_v59 = vld [vmem:[#allocation10 + $0xc0] ss:$16 sps:$4 sm:$0xff]   ;;  %v2171_v60 = vld [vmem:[#allocation10 + $0xc8] ss:$16 sps:$4 sm:$0xff]  }
 0x1dc   :  { %825 = vmatpush1.bf16.msra.mxu1 %v1912_v2  ;;  %866 = vmatpush1.bf16.msra.mxu0 %v1914_v3  ;;  %v900_v2 = vld [vmem:[#allocation5] sm:$0xff] }
 0x1dd   :  { %826 = vmatprep.subr.bf16.mxu1 %v1921_v4  ;;  %867 = vmatprep.subr.bf16.mxu0 %v1923_v5  ;;  %v2182_v3 = vld [vmem:[#allocation10 + $0x104] ss:$16 sps:$4 sm:$0xff]   ;;  %v2185_v4 = vld [vmem:[#allocation10 + $0x10c] ss:$16 sps:$4 sm:$0xff]   ;;  %v901_v5 = vpack.c.bf16 %v900_v2, %v900_v2 }
 0x1e0   :  { %827 = vmatpush1.bf16.msra.mxu1 %v1920_v10  ;;  %868 = vmatpush1.bf16.msra.mxu0 %v1922_v11  ;;  %v2186_v10 = vld [vmem:[#allocation10 + $0x120] ss:$16 sps:$4 sm:$0xff]   ;;  %v2189_v11 = vld [vmem:[#allocation10 + $0x128] ss:$16 sps:$4 sm:$0xff]  }
 0x1e1   :  { %828 = vmatprep.subr.bf16.mxu1 %v1929_v12  ;;  %869 = vmatprep.subr.bf16.mxu0 %v1931_v13  ;;  %v2194_v12 = vld [vmem:[#allocation10 + $0x144] ss:$16 sps:$4 sm:$0xff]   ;;  %v2197_v13 = vld [vmem:[#allocation10 + $0x14c] ss:$16 sps:$4 sm:$0xff]  }
 0x1e4   :  { %829 = vmatpush1.bf16.msra.mxu1 %v1928_v18  ;;  %870 = vmatpush1.bf16.msra.mxu0 %v1930_v19  ;;  %v2198_v18 = vld [vmem:[#allocation10 + $0x160] ss:$16 sps:$4 sm:$0xff]   ;;  %v2201_v19 = vld [vmem:[#allocation10 + $0x168] ss:$16 sps:$4 sm:$0xff]  }
 0x1e5   :  { %830 = vmatprep.subr.bf16.mxu1 %v1937_v20  ;;  %871 = vmatprep.subr.bf16.mxu0 %v1939_v21  ;;  %v2206_v20 = vld [vmem:[#allocation10 + $0x184] ss:$16 sps:$4 sm:$0xff]   ;;  %v2209_v21 = vld [vmem:[#allocation10 + $0x18c] ss:$16 sps:$4 sm:$0xff]  }
 0x1e8   :  { %831 = vmatpush1.bf16.msra.mxu1 %v1936_v26  ;;  %872 = vmatpush1.bf16.msra.mxu0 %v1938_v27  ;;  %v2213_v26 = vld [vmem:[#allocation10 + $0x1a8] ss:$16 sps:$4 sm:$0xff]   ;;  %v2218_v27 = vld [vmem:[#allocation10 + $0x1c4] ss:$16 sps:$4 sm:$0xff]  }
 0x1e9   :  { %832 = vmatprep.subr.bf16.mxu1 %v1945_v28  ;;  %873 = vmatprep.subr.bf16.mxu0 %v1947_v29  ;;  %v2221_v28 = vld [vmem:[#allocation10 + $0x1cc] ss:$16 sps:$4 sm:$0xff]   ;;  %v2216_v29 = vld [vmem:[#allocation10 + $0x1c0] ss:$16 sps:$4 sm:$0xff]  }
 0x1ec   :  { %833 = vmatpush1.bf16.msra.mxu1 %v1944_v30  ;;  %874 = vmatpush1.bf16.msra.mxu0 %v1946_v31  ;;  %v2219_v30 = vld [vmem:[#allocation10 + $0x1c8] ss:$16 sps:$4 sm:$0xff]   ;;  %v2224_v31 = vld [vmem:[#allocation10 + $0x1e4] ss:$16 sps:$4 sm:$0xff]  }
 0x1ed   :  { %1094 = vmatprep.subr.bf16.mxu1 %v2134_v32  ;;  %1135 = vmatprep.subr.bf16.mxu0 %v2137_v33  ;;  %v2227_v32 = vld [vmem:[#allocation10 + $0x1ec] ss:$16 sps:$4 sm:$0xff]   ;;  %v2222_v33 = vld [vmem:[#allocation10 + $0x1e0] ss:$16 sps:$4 sm:$0xff]  }
 0x1ef   :  { %851 = vmatmul.mubr.bf16.vlgmr.msra.gmra.mrb[4].mxu1 %v2708_v41  ;;  %892 = vmatmul.mubr.bf16.vlgmr.msra.gmra.mrb[8].mxu0 %v2708_v41  ;;  %v2155_v41 = vld [vmem:[#allocation10 + $0x6c] ss:$16 sps:$4 sm:$0xff]  }
 0x1f0   :  { %1095 = vmatpush1.bf16.msra.mxu1 %v2132_v34  ;;  %1136 = vmatpush1.bf16.msra.mxu0 %v2135_v35  ;;  %v2225_v34 = vld [vmem:[#allocation10 + $0x1e8] ss:$16 sps:$4 sm:$0xff]  }
 0x1f1   :  { %1096 = vmatprep.subr.bf16.mxu1 %v2140_v36  ;;  %1137 = vmatprep.subr.bf16.mxu0 %v2143_v37  ;;  %v1208_v35 = vld [vmem:[#allocation5 + $0x8] sm:$0xff]  ;;  %v377_v37 = vshrl.u32 %v127_v50, 7 }
 0x1f2   :  { %1126 = vmatprep.mubr.bf16.mxu1 %v2534_v0  ;;  %1167 = vmatprep.mubr.bf16.mxu0 %v2534_v0  ;;  %v1209_v36 = vpack.c.bf16 %v1208_v35, %v1208_v35 }
 0x1f4   :  { %1097 = vmatpush1.bf16.msra.mxu1 %v2138_v38  ;;  %1138 = vmatpush1.bf16.msra.mxu0 %v2141_v39  ;;  %v2721_v38 = vsub.s32 0, %v377_v37  ;;  %v386_v39 = vsub.s32 2, %v377_v37 }
 0x1f5   :  { %1098 = vmatprep.subr.bf16.mxu1 %v2146_v40  ;;  %1139 = vmatprep.subr.bf16.mxu0 %v2149_v42  ;;  %v374_v40 = vld [vmem:[%s2798_s6] sm:$0xff]  ;;  %v2726_v42 = vsub.s32 1, %v377_v37 }
 0x1f8   :  { %1099 = vmatpush1.bf16.msra.mxu1 %v2144_v43  ;;  %1140 = vmatpush1.bf16.msra.mxu0 %v2147_v44  ;;  %v390_v43 = vsub.s32 3, %v377_v37  ;;  %v379_v44 = vrot.slane %v374_v40, %v2721_v38 }
 0x1f9   :  { %1100 = vmatprep.subr.bf16.mxu1 %v2152_v45  ;;  %1141 = vmatprep.subr.bf16.mxu0 %v2155_v41  ;;  %v387_v45 = vrot.slane %v374_v40, %v386_v39  ;;  %v383_v41 = vrot.slane %v374_v40, %v2726_v42 }
 0x1fc   :  { %1101 = vmatpush1.bf16.msra.mxu1 %v2150_v46  ;;  %1142 = vmatpush1.bf16.msra.mxu0 %v2153_v47  ;;  %v391_v46 = vrot.slane %v374_v40, %v390_v43 }
 0x1fd   :  { %1102 = vmatprep.subr.bf16.mxu1 %v2158_v48  ;;  %1143 = vmatprep.subr.bf16.mxu0 %v2161_v49 }
 0x200   :  { %1103 = vmatpush1.bf16.msra.mxu1 %v2156_v51  ;;  %1144 = vmatpush1.bf16.msra.mxu0 %v2159_v52 }
 0x201   :  { %1104 = vmatprep.subr.bf16.mxu1 %v2164_v53  ;;  %1145 = vmatprep.subr.bf16.mxu0 %v2167_v54 }
 0x204   :  { %1105 = vmatpush1.bf16.msra.mxu1 %v2162_v55  ;;  %1146 = vmatpush1.bf16.msra.mxu0 %v2165_v56 }
 0x205   :  { %1106 = vmatprep.subr.bf16.mxu1 %v2170_v57  ;;  %1147 = vmatprep.subr.bf16.mxu0 %v2173_v58 }
 0x208   :  { %1107 = vmatpush1.bf16.msra.mxu1 %v2168_v59  ;;  %1148 = vmatpush1.bf16.msra.mxu0 %v2171_v60 }
 0x209   :  { %1108 = vmatprep.subr.bf16.mxu1 %v2176_v61  ;;  %1149 = vmatprep.subr.bf16.mxu0 %v2179_v62 }
 0x20c   :  { %1109 = vmatpush1.bf16.msra.mxu1 %v2174_v63  ;;  %1150 = vmatpush1.bf16.msra.mxu0 %v2177_v1 }
 0x20d   :  { %1403 = vmatprep.subr.bf16.mxu1 %v2182_v3  ;;  %1444 = vmatprep.subr.bf16.mxu0 %v2185_v4  ;;  %v394_v3 = vsub.s32 4, %v377_v37  ;;  %v402_v4 = vsub.s32 6, %v377_v37 }
 0x20f   :  { %1127 = vmatmul.mubr.bf16.vlgmr.msra.gmra.mrb[0].mxu1 %v901_v5  ;;  %1168 = vmatmul.mubr.bf16.vlgmr.msra.gmra.mrb[4].mxu0 %v901_v5 }
 0x210   :  { %1404 = vmatpush1.bf16.msra.mxu1 %v2180_v6  ;;  %1445 = vmatpush1.bf16.msra.mxu0 %v2183_v7  ;;  %v398_v6 = vsub.s32 5, %v377_v37  ;;  %v406_v7 = vsub.s32 7, %v377_v37 }
 0x211   :  { %1405 = vmatprep.subr.bf16.mxu1 %v2188_v8  ;;  %1446 = vmatprep.subr.bf16.mxu0 %v2191_v9  ;;  %v1199_v9 = vld [vmem:[#allocation7] sm:$0xff] }
 0x212   :  { %1435 = vmatprep.mubr.bf16.mxu1 %v2534_v0  ;;  %1476 = vmatprep.mubr.bf16.mxu0 %v2534_v0  ;;  %v2207_v0 = vld [vmem:[#allocation10 + $0x188] ss:$16 sps:$4 sm:$0xff]  }
 0x214   :  { %1406 = vmatpush1.bf16.msra.mxu1 %v2186_v10  ;;  %1447 = vmatpush1.bf16.msra.mxu0 %v2189_v11 }
 0x215   :  { %1407 = vmatprep.subr.bf16.mxu1 %v2194_v12  ;;  %1448 = vmatprep.subr.bf16.mxu0 %v2197_v13 }
 0x218   :  { %1408 = vmatpush1.bf16.msra.mxu1 %v2192_v14  ;;  %1449 = vmatpush1.bf16.msra.mxu0 %v2195_v15  ;;  %v395_v14 = vrot.slane %v374_v40, %v394_v3  ;;  %v403_v15 = vrot.slane %v374_v40, %v402_v4  ;;  %v2245_v3 = vld [vmem:[#allocation11 + $0x54] ss:$8 sps:$4 sm:$0xff]   ;;  %v2243_v4 = vld [vmem:[#allocation11 + $0x50] ss:$8 sps:$4 sm:$0xff]  }
 0x219   :  { %1409 = vmatprep.subr.bf16.mxu1 %v2200_v16  ;;  %1450 = vmatprep.subr.bf16.mxu0 %v2203_v17  ;;  %v399_v17 = vrot.slane %v374_v40, %v398_v6  ;;  %v2246_v6 = vld [vmem:[#allocation11 + $0x60] ss:$8 sps:$4 sm:$0xff]  }
 0x21c   :  { %1410 = vmatpush1.bf16.msra.mxu1 %v2198_v18  ;;  %1451 = vmatpush1.bf16.msra.mxu0 %v2201_v19  ;;  %v407_v18 = vrot.slane %v374_v40, %v406_v7  ;;  %v2251_v7 = vld [vmem:[#allocation11 + $0x74] ss:$8 sps:$4 sm:$0xff]  }
 0x21d   :  { %1411 = vmatprep.subr.bf16.mxu1 %v2206_v20  ;;  %1452 = vmatprep.subr.bf16.mxu0 %v2209_v21 }
 0x220   :  { %1412 = vmatpush1.bf16.msra.mxu1 %v2204_v22  ;;  %1453 = vmatpush1.bf16.msra.mxu0 %v2207_v0 }
 0x221   :  { %1413 = vmatprep.subr.bf16.mxu1 %v2212_v23  ;;  %1454 = vmatprep.subr.bf16.mxu0 %v2215_v24 }
 0x224   :  { %1414 = vmatpush1.bf16.msra.mxu1 %v2210_v25  ;;  %1455 = vmatpush1.bf16.msra.mxu0 %v2213_v26 }
 0x225   :  { %1415 = vmatprep.subr.bf16.mxu1 %v2218_v27  ;;  %1456 = vmatprep.subr.bf16.mxu0 %v2221_v28 }
 0x228   :  { %1416 = vmatpush1.bf16.msra.mxu1 %v2216_v29  ;;  %1457 = vmatpush1.bf16.msra.mxu0 %v2219_v30 }
 0x229   :  { %1417 = vmatprep.subr.bf16.mxu1 %v2224_v31  ;;  %1458 = vmatprep.subr.bf16.mxu0 %v2227_v32 }
 0x22c   :  { %1418 = vmatpush1.bf16.msra.mxu1 %v2222_v33  ;;  %1459 = vmatpush1.bf16.msra.mxu0 %v2225_v34 }
 0x22f   :  { %1436 = vmatmul.mubr.bf16.vlgmr.msra.gmra.mrb[4].mxu1 %v1209_v36  ;;  %1477 = vmatmul.mubr.bf16.vlgmr.msra.gmra.mrb[8].mxu0 %v1209_v36 }
 0x2e2   :  { %v1128_v47 = vpop.f32.mrb[0].mxu1  ;;  %v1169_v48 = vpop.f32.mrb[4].mxu0 }
 0x2e3   :  { %v2072_v49 = vadd.f32 %v1128_v47, %v379_v44  ;;  %v2074_v50 = vadd.f32 %v1169_v48, %v387_v45  ;;  %v1130_v51 = vpop.f32.mrb[1].mxu1  ;;  %v1171_v52 = vpop.f32.mrb[5].mxu0 }
 0x2e4   :  { %v2073_v53 = vadd.f32 %v1130_v51, %v383_v41  ;;  %v2075_v54 = vadd.f32 %v1171_v52, %v391_v46  ;;  %v1132_v55 = vpop.f32.mrb[2].mxu1  ;;  %v1173_v56 = vpop.f32.mrb[6].mxu0  ;;  %v1509_v41 = vld [vmem:[#allocation7 + $0x8] sm:$0xff] }
 0x2e5   :  { %v1980_v57 = vmul.f32 -1.442695, %v2072_v49  ;;  %v1133_v58 = vpop.f32.mrb[3].mxu1  ;;  %v1174_v59 = vpop.f32.mrb[7].mxu0  ;;  %v2228_v56 = vld [vmem:[#allocation11] ss:$8 sps:$4 sm:$0xff]  }
 0x2e6   :  { %v1981_v60 = vmul.f32 -1.442695, %v2073_v53  ;;  %v1982_v61 = vmul.f32 -1.442695, %v2075_v54  ;;  %v2233_v58 = vld [vmem:[#allocation11 + $0x14] ss:$8 sps:$4 sm:$0xff]  }
 0x2e7   :  { %2276 = vpow2.f32 %v1980_v57  ;;  %v2230_v57 = vld [vmem:[#allocation11 + $0x4] ss:$8 sps:$4 sm:$0xff]   ;;  %v2231_v59 = vld [vmem:[#allocation11 + $0x10] ss:$8 sps:$4 sm:$0xff]  }
 0x2e8   :  { %2278 = vpow2.f32 %v1981_v60  ;;  %1770 = vmatprep.subr.bf16.mxu1 %v2230_v57  ;;  %v2236_v60 = vld [vmem:[#allocation11 + $0x24] ss:$8 sps:$4 sm:$0xff]  }
 0x2e9   :  { %2280 = vpow2.f32 %v1982_v61  ;;  %1771 = vmatpush1.bf16.msra.mxu1 %v2228_v56  ;;  %v2234_v61 = vld [vmem:[#allocation11 + $0x20] ss:$8 sps:$4 sm:$0xff]  }
 0x2ea   :  { %2282 = vtanh.f32 %v2074_v50  ;;  %1772 = vmatprep.subr.bf16.mxu1 %v2233_v58 }
 0x2ed   :  { %1773 = vmatpush1.bf16.msra.mxu1 %v2231_v59 }
 0x2ee   :  { %1774 = vmatprep.subr.bf16.mxu1 %v2236_v60 }
 0x2f1   :  { %v2277_v62 = vpop.eup %2276  ;;  %1775 = vmatpush1.bf16.msra.mxu1 %v2234_v61 }
 0x2f2   :  { %v2279_v63 = vpop.eup %2278  ;;  %v1183_v1 = vadd.f32 1.0, %v2277_v62  ;;  %v2239_v62 = vld [vmem:[#allocation11 + $0x34] ss:$8 sps:$4 sm:$0xff]  }
 0x2f3   :  { %v1189_v2 = vadd.f32 1.0, %v2279_v63  ;;  %v2281_v5 = vpop.eup %2280  ;;  %v2237_v63 = vld [vmem:[#allocation11 + $0x30] ss:$8 sps:$4 sm:$0xff]   ;;  %1776 = vmatprep.subr.bf16.mxu1 %v2239_v62 }
 0x2f4   :  { %2284 = vrcp.f32 %v1183_v1  ;;  %v2283_v8 = vpop.eup %2282  ;;  %v1196_v13 = vadd.f32 1.0, %v2281_v5  ;;  %v2242_v1 = vld [vmem:[#allocation11 + $0x44] ss:$8 sps:$4 sm:$0xff]  }
 0x2f5   :  { %2286 = vrcp.f32 %v1189_v2  ;;  %1777 = vmatpush1.bf16.msra.mxu1 %v2237_v63  ;;  %v2240_v2 = vld [vmem:[#allocation11 + $0x40] ss:$8 sps:$4 sm:$0xff]   ;;  %v2248_v5 = vld [vmem:[#allocation11 + $0x64] ss:$8 sps:$4 sm:$0xff]  }
 0x2f6   :  { %2288 = vrcp.f32 %v1196_v13  ;;  %1778 = vmatprep.subr.bf16.mxu1 %v2242_v1 }
 0x2f9   :  { %1779 = vmatpush1.bf16.msra.mxu1 %v2240_v2 }
 0x2fa   :  { %1780 = vmatprep.subr.bf16.mxu1 %v2245_v3 }
 0x2fd   :  { %1781 = vmatpush1.bf16.msra.mxu1 %v2243_v4 }
 0x2fe   :  { %v2285_v10 = vpop.eup %2284  ;;  %1782 = vmatprep.subr.bf16.mxu1 %v2248_v5 }
 0x2ff   :  { %v2287_v11 = vpop.eup %2286  ;;  %v1201_v12 = vmul.f32 %v2285_v10, %v2283_v8  ;;  %v2249_v8 = vld [vmem:[#allocation11 + $0x70] ss:$8 sps:$4 sm:$0xff]   ;;  %v2252_v10 = vld [vmem:[#allocation11 + $0x80] ss:$8 sps:$4 sm:$0xff]  }
 0x300   :  { %v1200_v16 = vmul.f32 %v2287_v11, %v1199_v9  ;;  %v2289_v33 = vpop.eup %2288  ;;  %v2254_v9 = vld [vmem:[#allocation11 + $0x84] ss:$8 sps:$4 sm:$0xff]   ;;  %v2257_v11 = vld [vmem:[#allocation11 + $0x94] ss:$8 sps:$4 sm:$0xff]  }
 0x301   :  { %1783 = vmatpush1.bf16.msra.mxu1 %v2246_v6 }
 0x302   :  { %v1202_v19 = vadd.f32 %v1201_v12, %v1200_v16  ;;  %v1437_v20 = vpop.f32.mrb[4].mxu1  ;;  %v1478_v21 = vpop.f32.mrb[8].mxu0  ;;  %1784 = vmatprep.subr.bf16.mxu1 %v2251_v7  ;;  %v2255_v12 = vld [vmem:[#allocation11 + $0x90] ss:$8 sps:$4 sm:$0xff]  }
 0x303   :  { %v2076_v22 = vadd.f32 %v1437_v20, %v395_v14  ;;  %v2078_v0 = vadd.f32 %v1478_v21, %v403_v15  ;;  %v1439_v23 = vpop.f32.mrb[5].mxu1  ;;  %v1480_v24 = vpop.f32.mrb[9].mxu0  ;;  %v2260_v20 = vld [vmem:[#allocation11 + $0xa4] ss:$8 sps:$4 sm:$0xff]   ;;  %v2258_v21 = vld [vmem:[#allocation11 + $0xa0] ss:$8 sps:$4 sm:$0xff]  }
 0x304   :  { %1206 = vst [vmem:[#allocation16] sm:$0xff] %v1202_v19  ;;  %v2077_v25 = vadd.f32 %v1439_v23, %v399_v17  ;;  %v2079_v26 = vadd.f32 %v1480_v24, %v407_v18  ;;  %v1441_v27 = vpop.f32.mrb[6].mxu1  ;;  %v1482_v28 = vpop.f32.mrb[10].mxu0  ;;  %2290 = vtanh.f32 %v1202_v19  ;;  %v2266_v23 = vld [vmem:[#allocation11 + $0xc4] ss:$8 sps:$4 sm:$0xff]  }
 0x305   :  { %v2015_v29 = vmul.f32 -1.442695, %v2076_v22  ;;  %v1442_v30 = vpop.f32.mrb[7].mxu1  ;;  %v1483_v31 = vpop.f32.mrb[11].mxu0  ;;  %1785 = vmatpush1.bf16.msra.mxu1 %v2249_v8  ;;  %v2263_v22 = vld [vmem:[#allocation11 + $0xb4] ss:$8 sps:$4 sm:$0xff]  }
 0x306   :  { %v2016_v32 = vmul.f32 -1.442695, %v2077_v25  ;;  %v2017_v35 = vmul.f32 -1.442695, %v2079_v26  ;;  %1786 = vmatprep.subr.bf16.mxu1 %v2254_v9  ;;  %v2264_v24 = vld [vmem:[#allocation11 + $0xc0] ss:$8 sps:$4 sm:$0xff]  }
 0x307   :  { %2292 = vpow2.f32 %v2015_v29  ;;  %v2269_v25 = vld [vmem:[#allocation11 + $0xd4] ss:$8 sps:$4 sm:$0xff]   ;;  %v2267_v26 = vld [vmem:[#allocation11 + $0xd0] ss:$8 sps:$4 sm:$0xff]   ;;  %v2270_v27 = vld [vmem:[#allocation11 + $0xe0] ss:$8 sps:$4 sm:$0xff]  }
 0x308   :  { %2294 = vpow2.f32 %v2016_v32  ;;  %v2272_v28 = vld [vmem:[#allocation11 + $0xe4] ss:$8 sps:$4 sm:$0xff]   ;;  %v2275_v29 = vld [vmem:[#allocation11 + $0xf4] ss:$8 sps:$4 sm:$0xff]   ;;  %v2273_v30 = vld [vmem:[#allocation11 + $0xf0] ss:$8 sps:$4 sm:$0xff]  }
 0x309   :  { %2296 = vpow2.f32 %v2017_v35  ;;  %1787 = vmatpush1.bf16.msra.mxu1 %v2252_v10  ;;  %v1550_v35 = vld [vmem:[%s2800_s8] sm:$0x3] }
 0x30a   :  { %2298 = vtanh.f32 %v2078_v0  ;;  %1788 = vmatprep.subr.bf16.mxu1 %v2257_v11  ;;  %v2261_v0 = vld [vmem:[#allocation11 + $0xb0] ss:$8 sps:$4 sm:$0xff]  }
 0x30d   :  { %1789 = vmatpush1.bf16.msra.mxu1 %v2255_v12 }
 0x30e   :  { %v2291_v34 = vpop.eup %2290  ;;  %1790 = vmatprep.subr.bf16.mxu1 %v2260_v20 }
 0x30f   :  { %v2730_v36 = vmul.f32 %v2291_v34, %v2289_v33  ;;  %v1536_v34 = vld [vmem:[%s2799_s7] sm:$0x3]  ;;  %s2536_s7 = smov [#allocation14]  }
 0x310   :  { %s1828_s8 = sshll.u32 %s2536_s7, 4  ;;  %s1829_s8 = int_to_ptr.vmem [resolvable:$true] %s1828_s8 }
 0x311   :  { %v2293_v37 = vpop.eup %2292  ;;  %1205 = vst [vmem:[#allocation14] sm:$0xff] %v2730_v36  ;;  %1791 = vmatpush1.bf16.msra.mxu1 %v2258_v21  ;;  %s2442_s16 = scalar_lea.vmem %s1829_s8, 256  ;;  %p2447_p7 = scmp.lt.s32.totalorder %s1829_s8, %s1829_s8 }
 0x312   :  { %v2295_v39 = vpop.eup %2294  ;;  %v1492_v40 = vadd.f32 1.0, %v2293_v37  ;;  %1792 = vmatprep.subr.bf16.mxu1 %v2263_v22  ;;  %v1545_v37 = vrot.slane %v1536_v34, %v2726_v42  ;;  %p2443_p6 = scmp.ne.s32.totalorder %s1829_s8, %s2442_s16  ;;  %p2448_p8 = scmp.lt.s32.totalorder %s2442_s16, %s2442_s16 }
 0x313   :  { %v1498_v43 = vadd.f32 1.0, %v2295_v39  ;;  %v2297_v44 = vpop.eup %2296 }
 0x314   :  { %2300 = vrcp.f32 %v1492_v40  ;;  %v2299_v45 = vpop.eup %2298  ;;  %v1505_v49 = vadd.f32 1.0, %v2297_v44  ;;  %v1555_v44 = vrot.slane %v1550_v35, %v2721_v38  ;;  %p2449_p9 = por %p2448_p8, %p2447_p7 }
 0x315   :  { %2302 = vrcp.f32 %v1498_v43  ;;  %1793 = vmatpush1.bf16.msra.mxu1 %v2261_v0 }
 0x316   :  { %2304 = vrcp.f32 %v1505_v49  ;;  %1794 = vmatprep.subr.bf16.mxu1 %v2266_v23  ;;  %p2450_p10 = pnand %p2449_p9, %p2443_p6 }
 0x319   :  { %1795 = vmatpush1.bf16.msra.mxu1 %v2264_v24 }
 0x31a   :  { %1796 = vmatprep.subr.bf16.mxu1 %v2269_v25 }
 0x31d   :  { %1797 = vmatpush1.bf16.msra.mxu1 %v2267_v26 }
 0x31e   :  { %v2301_v46 = vpop.eup %2300  ;;  %1798 = vmatprep.subr.bf16.mxu1 %v2272_v28 }
 0x31f   :  { %v2303_v47 = vpop.eup %2302  ;;  %v1511_v48 = vmul.f32 %v2301_v46, %v2299_v45  ;;  %v1559_v45 = vrot.slane %v1550_v35, %v2726_v42 }
 0x320   :  { %v1510_v50 = vmul.f32 %v2303_v47, %v1509_v41  ;;  %v2305_v52 = vpop.eup %2304 }
 0x321   :  { %1799 = vmatpush1.bf16.msra.mxu1 %v2270_v27 }
 0x322   :  { %v1512_v51 = vadd.f32 %v1511_v48, %v1510_v50  ;;  %1800 = vmatprep.subr.bf16.mxu1 %v2275_v29 }
 0x324   :  { %1518 = vst [vmem:[#allocation16 + $0x8] sm:$0xff] %v1512_v51  ;;  %2306 = vtanh.f32 %v1512_v51 }
 0x325   :  { %1801 = vmatpush1.bf16.msra.mxu1 %v2273_v30 }
 0x32e   :  { %v2307_v53 = vpop.eup %2306 }
 0x32f   :  { %v1514_v54 = vmul.f32 %v2307_v53, %v2305_v52 }
 0x331   :  { %v1519_v55 = vadd.f32 %v1514_v54, %v2730_v36  ;;  %1516 = vst [vmem:[#allocation14 + $0x8] sm:$0xff] %v1514_v54 }
 0x333   :  { %1520 = vadd.xlane.f32.xlu0 %v1519_v55 }
 0x3c0   :  { %v1521_v13 = vpop.xlane.xlu0 %1520 }
 0x3c1   :  { %v1523_v14 = vmul.f32 0.00390625, %v1521_v13 }
 0x3c3   :  { %v1524_v15 = vsub.f32 %v2730_v36, %v1523_v14  ;;  %v1525_v16 = vsub.f32 %v1514_v54, %v1523_v14  ;;  %v1541_v36 = vrot.slane %v1536_v34, %v2721_v38 }
 0x3c5   :  { %v1526_v17 = vmul.f32 %v1524_v15, %v1524_v15  ;;  %v1527_v18 = vmul.f32 %v1525_v16, %v1525_v16 }
 0x3c7   :  { %v1528_v19 = vadd.f32 %v1527_v18, %v1526_v17 }
 0x3c9   :  { %1529 = vadd.xlane.f32.xlu1 %v1528_v19 }
 0x456   :  { %v1530_v31 = vpop.xlane.xlu1 %1529 }
 0x457   :  { %v1531_v32 = vmul.f32 0.00390625, %v1530_v31 }
 0x459   :  { %v1532_v33 = vadd.f32 1e-05, %v1531_v32 }
 0x45b   :  { %2308 = vrsqrt.f32 %v1532_v33 }
 0x465   :  { %v2309_v39 = vpop.eup %2308 }
 0x466   :  { %v1534_v40 = vmul.f32 %v2309_v39, %v1524_v15  ;;  %v1535_v43 = vmul.f32 %v2309_v39, %v1525_v16 }
 0x468   :  { %v1549_v41 = vmul.f32 %v1545_v37, %v1535_v43  ;;  %v1548_v46 = vmul.f32 %v1541_v36, %v1534_v40 }
 0x46a   :  { %v1563_v47 = vadd.f32 %v1559_v45, %v1549_v41  ;;  %v1562_v48 = vadd.f32 %v1555_v44, %v1548_v46 }
 0x46c   :  { %v1565_v49 = vpack.c.bf16 %v1563_v47, %v1563_v47  ;;  %v1564_v50 = vpack.c.bf16 %v1562_v48, %v1562_v48 }
 0x46e   :  { %1802 = vmatprep.mubr.bf16.mxu1 %v1565_v49 }
 0x46f   :  { %1803 = vmatmul.mubr.bf16.vlgmr.msra.gmra.mrb[8].mxu1 %v1564_v50 }
 0x470   :  { %2453 = shalt.err (!%p2450_p10)
}
 0x471   :  { %s2454_s28 = scalar_lea.hbm %s2804_s12, 256 }
 0x472   :  { %p2455_p11 = scmp.ne.s32.totalorder %s2804_s12, %s2454_s28  ;;  %p2458_p12 = scmp.lt.u32.totalorder %s2454_s28, %s2804_s12 }
 0x474   :  { %p2460_p13 = pnand %p2458_p12, %p2455_p11 }
 0x476   :  { %2463 = shalt.err (!%p2460_p13)
}
 0x477   :  { %1834 = dma.vmem_to_hbm [thread:$0]  %s1829_s8, 256, %s2804_s12, [#allocation15], %s2521_s18, %s2521_s18, %s2522_s19  }
 0x478   :  { %s2537_s23 = smov [#allocation16]  }
 0x479   :  { %s1840_s15 = sshll.u32 %s2537_s23, 4  ;;  %s1841_s15 = int_to_ptr.vmem [resolvable:$true] %s1840_s15 }
 0x47a   :  { %s2464_s2 = scalar_lea.vmem %s1841_s15, 256  ;;  %p2469_p1 = scmp.lt.s32.totalorder %s1841_s15, %s1841_s15 }
 0x47b   :  { %p2465_p0 = scmp.ne.s32.totalorder %s1841_s15, %s2464_s2  ;;  %p2470_p2 = scmp.lt.s32.totalorder %s2464_s2, %s2464_s2 }
 0x47d   :  { %p2471_p3 = por %p2470_p2, %p2469_p1 }
 0x47f   :  { %p2472_p4 = pnand %p2471_p3, %p2465_p0 }
 0x481   :  { %2475 = shalt.err (!%p2472_p4)
}
 0x482   :  { %s2476_s26 = scalar_lea.hbm %s2805_s13, 256 }
 0x483   :  { %p2477_p5 = scmp.ne.s32.totalorder %s2805_s13, %s2476_s26  ;;  %p2480_p6 = scmp.lt.u32.totalorder %s2476_s26, %s2805_s13 }
 0x485   :  { %p2482_p7 = pnand %p2480_p6, %p2477_p5 }
 0x487   :  { %2485 = shalt.err (!%p2482_p7)
}
 0x488   :  { %1846 = dma.vmem_to_hbm [thread:$0]  %s1841_s15, 256, %s2805_s13, [#allocation15], %s2521_s18, %s2521_s18, %s2522_s19  }
 0x489   :  { %v1598_v51 = vld [vmem:[%s2802_s10] sm:$0x3]  ;;  %s2538_s7 = smov [#allocation13]  }
 0x48a   :  { %v1603_v52 = vrot.slane %v1598_v51, %v2721_v38  ;;  %v1607_v53 = vrot.slane %v1598_v51, %v2726_v42  ;;  %s1819_s8 = sshll.u32 %s2538_s7, 4  ;;  %s1820_s8 = int_to_ptr.vmem [resolvable:$true] %s1819_s8 }
 0x48b   :  { %s2486_s13 = scalar_lea.vmem %s1820_s8, 256  ;;  %p2491_p9 = scmp.lt.s32.totalorder %s1820_s8, %s1820_s8 }
 0x48c   :  { %p2487_p8 = scmp.ne.s32.totalorder %s1820_s8, %s2486_s13  ;;  %p2492_p10 = scmp.lt.s32.totalorder %s2486_s13, %s2486_s13 }
 0x48e   :  { %p2493_p11 = por %p2492_p10, %p2491_p9 }
 0x490   :  { %p2494_p12 = pnand %p2493_p11, %p2487_p8 }
 0x542   :  { %v1804_v54 = vpop.f32.mrb[8].mxu1 }
 0x543   :  { %v1805_v55 = vadd.f32 %v1804_v54, %v1603_v52  ;;  %v1806_v56 = vpop.f32.mrb[9].mxu1 }
 0x544   :  { %v1807_v57 = vadd.f32 %v1806_v56, %v1607_v53  ;;  %v1808_v58 = vpop.f32.mrb[10].mxu1 }
 0x545   :  { %1811 = vst [vmem:[#allocation13] sm:$0xff] %v1805_v55  ;;  %v1809_v59 = vpop.f32.mrb[11].mxu1 }
 0x546   :  { %1812 = vst [vmem:[#allocation13 + $0x8] sm:$0xff] %v1807_v57 }
 0x547   :  { %2497 = shalt.err (!%p2494_p12)
}
 0x548   :  { %s2498_s19 = scalar_lea.hbm %s2803_s11, 256 }
 0x549   :  { %p2499_p13 = scmp.ne.s32.totalorder %s2803_s11, %s2498_s19  ;;  %p2502_p0 = scmp.lt.u32.totalorder %s2498_s19, %s2803_s11 }
 0x54b   :  { %p2504_p1 = pnand %p2502_p0, %p2499_p13 }
 0x54d   :  { %2507 = shalt.err (!%p2504_p1)
}
 0x54e   :  { %1822 = dma.vmem_to_hbm [thread:$0]  %s1820_s8, 256, %s2803_s11, [#allocation4]  }
 0x54f   :  { %2516 = dma.done.wait [#allocation4], 256  }
 0x550   :  { %2517 = vsyncadd [#allocation4], 4294967040 }
 0x551   :  { %2518 = dma.done.wait [#allocation15], 512  }
 0x552   :  { %2519 = vsyncadd [#allocation15], 4294966784 }
 0x553   :  { %1856 = vsyncpa [#allocation3], 1 }
 0x554   :  { %1857 = vsyncpa [#allocation6], 1 }
 0x555   :  { %1858 = vsyncpa [#allocation9], 1 }
 0x556   :  { %1859 = vsyncpa [#allocation12], 1 }
 0x557   :  { %1860 = vsyncpa [#allocation4], 1 }
 0x558   :  { %1861 = vsyncpa [#allocation15], 1 }

</bundles_post_ra>
